<compile_context>
chip_gen: v6e
topology: v6e:2x2x1
jax: 0.10.0
libtpu: 0.0.40
codegen_flags: <defaults>
</compile_context>

<pallas_src>
import functools
import math

import jax
import jax.numpy as jnp
from jax import lax
from jax.experimental import pallas as pl
from jax.experimental.pallas import tpu as pltpu


def _layer_norm(v, gamma, beta, eps=1e-5):
    # single-pass stats: E[x] and E[x^2] (independent reductions)
    mu = jnp.mean(v, axis=-1, keepdims=True)
    msq = jnp.mean(v * v, axis=-1, keepdims=True)
    var = msq - mu * mu
    return (v - mu) * lax.rsqrt(var + eps) * gamma + beta


def _gelu_exact(x):
    # exact erf-based GELU (PyTorch nn.GELU() default)
    return 0.5 * x * (1.0 + lax.erf(x * (1.0 / math.sqrt(2.0))))


def transformer_block_kernel(
    # inputs
    x_q_ref, x_full_ref,
    g1_ref, b1_ref,
    wq_ref, bq_ref, wk_ref, bk_ref, wv_ref, bv_ref,
    woh_ref, bo_ref,
    g2_ref, b2_ref,
    w1_ref, bb1_ref,
    w2_ref, bb2_ref,
    # outputs
    out_ref,
    # scratch
    k_scr, v_scr, q_scr,
    *, num_heads, head_dim,
):
    cdt = wq_ref.dtype                    # MXU input dtype (f32 or bf16)
    scale = head_dim ** (-0.5)
    qi = pl.program_id(1)

    # ---- once per batch element: project K/V for the whole sequence into
    #      head-major VMEM scratch (persists across the q-tile axis) ----
    @pl.when(qi == 0)
    def _():
        xf = x_full_ref[0]                                        # (N, D) f32
        hf = _layer_norm(xf, g1_ref[...], b1_ref[...]).astype(cdt)
        kf = jnp.dot(hf, wk_ref[...],
                     preferred_element_type=jnp.float32) + bk_ref[...]
        vf = jnp.dot(hf, wv_ref[...],
                     preferred_element_type=jnp.float32) + bv_ref[...]
        for h in range(num_heads):                                # one-time scatter
            lo = h * head_dim
            k_scr[h] = kf[:, lo:lo + head_dim].astype(cdt)
            v_scr[h] = vf[:, lo:lo + head_dim].astype(cdt)

    # ---- per query tile ----
    xq = x_q_ref[0]                                               # (TQ, D) f32
    hq = _layer_norm(xq, g1_ref[...], b1_ref[...]).astype(cdt)
    qf = jnp.dot(hq, wq_ref[...],
                 preferred_element_type=jnp.float32) + bq_ref[...]
    for h in range(num_heads):
        lo = h * head_dim
        q_scr[h] = qf[:, lo:lo + head_dim].astype(cdt)

    q_h = q_scr[...]                                              # (H, TQ, hd)
    k_h = k_scr[...]                                              # (H, N,  hd)
    v_h = v_scr[...]                                              # (H, N,  hd)

    # head-batched attention
    s = jnp.einsum("hqd,hkd->hqk", q_h, k_h,
                   preferred_element_type=jnp.float32) * scale    # (H, TQ, N)
    s = s - jnp.max(s, axis=-1, keepdims=True)
    p = jnp.exp(s)
    p = p * pl.reciprocal(jnp.sum(p, axis=-1, keepdims=True), approx=True)
    o = jnp.einsum("hqk,hkd->hqd", p.astype(cdt), v_h,
                   preferred_element_type=jnp.float32)            # (H, TQ, hd)

    # output projection: sum_h o_h @ Wo[h]  (head-major wo, no concatenate)
    proj = jnp.einsum("hqd,hde->hqe", o.astype(cdt), woh_ref[...],
                      preferred_element_type=jnp.float32)         # (H, TQ, D)
    attn = jnp.sum(proj, axis=0) + bo_ref[...]                    # (TQ, D)

    x1 = xq + attn                       # residual 1 (dropout = identity in eval)

    # ---- MLP branch ----
    h2 = _layer_norm(x1, g2_ref[...], b2_ref[...]).astype(cdt)
    m = jnp.dot(h2, w1_ref[...],
                preferred_element_type=jnp.float32) + bb1_ref[...]
    m = _gelu_exact(m).astype(cdt)
    m = jnp.dot(m, w2_ref[...],
                preferred_element_type=jnp.float32) + bb2_ref[...]

    out_ref[0] = (x1 + m).astype(out_ref.dtype)                   # residual 2


def transformer_block(x, params, *, num_heads, q_tile=None,
                      compute_dtype=jnp.float32):
    B, N, D = x.shape
    assert D % num_heads == 0
    head_dim = D // num_heads
    Hm = params["w1"].shape[1]            # mlp hidden

    if q_tile is None:
        q_tile = N if N <= 128 else 128   # v5e-friendly 128-row tiles
    assert N % q_tile == 0
    n_q = N // q_tile

    cdt = compute_dtype

    # Static weight splits / head-major re-layout done in XLA (free), so the
    # kernel never lane-slices a (N, 3D) activation.
    wqkv, bqkv = params["wqkv"], params["bqkv"]
    wq = wqkv[:, 0 * D:1 * D].astype(cdt)
    wk = wqkv[:, 1 * D:2 * D].astype(cdt)
    wv = wqkv[:, 2 * D:3 * D].astype(cdt)
    bq = bqkv[:, 0 * D:1 * D]
    bk = bqkv[:, 1 * D:2 * D]
    bv = bqkv[:, 2 * D:3 * D]
    wo_h = params["wo"].reshape(num_heads, head_dim, D).astype(cdt)
    w1 = params["w1"].astype(cdt)
    w2 = params["w2"].astype(cdt)

    kernel = functools.partial(transformer_block_kernel,
                               num_heads=num_heads, head_dim=head_dim)

    def const(shape):
        return pl.BlockSpec(shape, lambda b, qi, _s=shape: tuple(0 for _ in _s))

    in_specs = [
        pl.BlockSpec((1, q_tile, D), lambda b, qi: (b, qi, 0)),   # x (query tile)
        pl.BlockSpec((1, N, D), lambda b, qi: (b, 0, 0)),         # x (full, for K/V)
        const((1, D)), const((1, D)),                             # ln1 gamma/beta
        const((D, D)), const((1, D)),                             # wq, bq
        const((D, D)), const((1, D)),                             # wk, bk
        const((D, D)), const((1, D)),                             # wv, bv
        const((num_heads, head_dim, D)), const((1, D)),           # wo (head-major), bo
        const((1, D)), const((1, D)),                             # ln2 gamma/beta
        const((D, Hm)), const((1, Hm)),                           # mlp fc1
        const((Hm, D)), const((1, D)),                            # mlp fc2
    ]
    out_specs = pl.BlockSpec((1, q_tile, D), lambda b, qi: (b, qi, 0))

    return pl.pallas_call(
        kernel,
        out_shape=jax.ShapeDtypeStruct((B, N, D), jnp.float32),
        grid_spec=pltpu.PrefetchScalarGridSpec(
            num_scalar_prefetch=0,
            grid=(B, n_q),
            in_specs=in_specs,
            out_specs=out_specs,
            scratch_shapes=[
                pltpu.VMEM((num_heads, N, head_dim), cdt),        # K scratch
                pltpu.VMEM((num_heads, N, head_dim), cdt),        # V scratch
                pltpu.VMEM((num_heads, q_tile, head_dim), cdt),   # Q scratch
            ],
        ),
        compiler_params=pltpu.CompilerParams(
            dimension_semantics=("parallel", "arbitrary"),
            vmem_limit_bytes=64 * 1024 * 1024,
        ),
    )(
        x, x,
        params["ln1_g"], params["ln1_b"],
        wq, bq, wk, bk, wv, bv,
        wo_h, params["bo"],
        params["ln2_g"], params["ln2_b"],
        w1, params["b1"],
        w2, params["b2"],
    )


def init_params(key, proj_dim, mlp_ratio):
    hidden = int(proj_dim * mlp_ratio)
    ks = jax.random.split(key, 8)

    def lin(k, fan_in, fan_out):
        bound = 1.0 / math.sqrt(fan_in)
        kw, kb = jax.random.split(k)
        w = jax.random.uniform(kw, (fan_in, fan_out), jnp.float32, -bound, bound)
        b = jax.random.uniform(kb, (1, fan_out), jnp.float32, -bound, bound)
        return w, b

    wqkv, bqkv = lin(ks[0], proj_dim, 3 * proj_dim)
    wo, bo = lin(ks[1], proj_dim, proj_dim)
    w1, b1 = lin(ks[2], proj_dim, hidden)
    w2, b2 = lin(ks[3], hidden, proj_dim)

    return {
        "ln1_g": jnp.ones((1, proj_dim), jnp.float32),
        "ln1_b": jnp.zeros((1, proj_dim), jnp.float32),
        "ln2_g": jnp.ones((1, proj_dim), jnp.float32),
        "ln2_b": jnp.zeros((1, proj_dim), jnp.float32),
        "wqkv": wqkv, "bqkv": bqkv,
        "wo": wo, "bo": bo,
        "w1": w1, "b1": b1,
        "w2": w2, "b2": b2,
    }


def reference_transformer_block(x, params, *, num_heads):
    B, N, D = x.shape
    hd = D // num_heads

    def ln(v, g, b):
        mu = jnp.mean(v, -1, keepdims=True)
        var = jnp.mean((v - mu) ** 2, -1, keepdims=True)
        return (v - mu) / jnp.sqrt(var + 1e-5) * g + b

    h = ln(x, params["ln1_g"], params["ln1_b"])
    qkv = h @ params["wqkv"] + params["bqkv"]
    q, k, v = jnp.split(qkv, 3, axis=-1)
    q = q.reshape(B, N, num_heads, hd).transpose(0, 2, 1, 3)
    k = k.reshape(B, N, num_heads, hd).transpose(0, 2, 1, 3)
    v = v.reshape(B, N, num_heads, hd).transpose(0, 2, 1, 3)
    att = jnp.einsum("bhqd,bhkd->bhqk", q, k) * (hd ** -0.5)
    att = jax.nn.softmax(att, axis=-1)
    o = jnp.einsum("bhqk,bhkd->bhqd", att, v).transpose(0, 2, 1, 3).reshape(B, N, D)
    o = o @ params["wo"] + params["bo"]
    x = x + o
    h2 = ln(x, params["ln2_g"], params["ln2_b"])
    m = h2 @ params["w1"] + params["b1"]
    m = jax.nn.gelu(m, approximate=False)
    m = m @ params["w2"] + params["b2"]
    return x + m


if __name__ == "__main__":
    B, N, D = 2, 8, 32
    num_heads = 4
    mlp_ratio = 4.0

    key = jax.random.PRNGKey(0)
    kx, kp = jax.random.split(key)
    x = jax.random.normal(kx, (B, N, D), jnp.float32)
    params = init_params(kp, D, mlp_ratio)

    ref = reference_transformer_block(x, params, num_heads=num_heads)

    # f32 MXU inputs (approx EUP reciprocal in softmax -> slightly loosened tol)
    out = jax.block_until_ready(transformer_block(x, params, num_heads=num_heads))
    assert out.shape == (B, N, D)
    assert jnp.allclose(out, ref, atol=2e-2, rtol=2e-2), "f32 mismatch vs reference"

    # bf16 MXU inputs with f32 accumulation (2x MXU / VMEM win on v6e/v7x)
    out_bf16 = jax.block_until_ready(
        transformer_block(x, params, num_heads=num_heads,
                          compute_dtype=jnp.bfloat16))
    assert jnp.allclose(out_bf16, ref, atol=1e-1, rtol=1e-1), "bf16 mismatch vs reference"

    print("KERNEL_OK")
</pallas_src>

<mosaic_0001>
module attributes {stable_mosaic.version = 11 : i64} {
  func.func @transformer_block_kernel(%arg0: i32, %arg1: i32, %arg2: memref<1x8x32xf32, #tpu.memory_space<vmem>>, %arg3: memref<1x8x32xf32, #tpu.memory_space<vmem>>, %arg4: memref<1x32xf32, #tpu.memory_space<vmem>>, %arg5: memref<1x32xf32, #tpu.memory_space<vmem>>, %arg6: memref<32x32xf32, #tpu.memory_space<vmem>>, %arg7: memref<1x32xf32, #tpu.memory_space<vmem>>, %arg8: memref<32x32xf32, #tpu.memory_space<vmem>>, %arg9: memref<1x32xf32, #tpu.memory_space<vmem>>, %arg10: memref<32x32xf32, #tpu.memory_space<vmem>>, %arg11: memref<1x32xf32, #tpu.memory_space<vmem>>, %arg12: memref<4x8x32xf32, #tpu.memory_space<vmem>>, %arg13: memref<1x32xf32, #tpu.memory_space<vmem>>, %arg14: memref<1x32xf32, #tpu.memory_space<vmem>>, %arg15: memref<1x32xf32, #tpu.memory_space<vmem>>, %arg16: memref<32x128xf32, #tpu.memory_space<vmem>>, %arg17: memref<1x128xf32, #tpu.memory_space<vmem>>, %arg18: memref<128x32xf32, #tpu.memory_space<vmem>>, %arg19: memref<1x32xf32, #tpu.memory_space<vmem>>, %arg20: memref<1x8x32xf32, #tpu.memory_space<vmem>>, %arg21: memref<4x8x8xf32, #tpu.memory_space<vmem>>, %arg22: memref<4x8x8xf32, #tpu.memory_space<vmem>>, %arg23: memref<4x8x8xf32, #tpu.memory_space<vmem>>) attributes {dimension_semantics = [#tpu.dimension_semantics<parallel>, #tpu.dimension_semantics<arbitrary>], iteration_bounds = array<i64: 2, 1>, scalar_prefetch = 0 : i64, scratch_operands = 3 : i64, tpu.core_type = #tpu.core_type<tc>, window_params = [{transform_indices = @transform_0, window_bounds = array<i64: 1, 8, 32>}, {transform_indices = @transform_1, window_bounds = array<i64: 1, 8, 32>}, {pipeline_mode = #tpu.pipeline_mode<synchronous>, transform_indices = @transform_2, window_bounds = array<i64: 1, 32>}, {pipeline_mode = #tpu.pipeline_mode<synchronous>, transform_indices = @transform_3, window_bounds = array<i64: 1, 32>}, {pipeline_mode = #tpu.pipeline_mode<synchronous>, transform_indices = @transform_4, window_bounds = array<i64: 32, 32>}, {pipeline_mode = #tpu.pipeline_mode<synchronous>, transform_indices = @transform_5, window_bounds = array<i64: 1, 32>}, {pipeline_mode = #tpu.pipeline_mode<synchronous>, transform_indices = @transform_6, window_bounds = array<i64: 32, 32>}, {pipeline_mode = #tpu.pipeline_mode<synchronous>, transform_indices = @transform_7, window_bounds = array<i64: 1, 32>}, {pipeline_mode = #tpu.pipeline_mode<synchronous>, transform_indices = @transform_8, window_bounds = array<i64: 32, 32>}, {pipeline_mode = #tpu.pipeline_mode<synchronous>, transform_indices = @transform_9, window_bounds = array<i64: 1, 32>}, {pipeline_mode = #tpu.pipeline_mode<synchronous>, transform_indices = @transform_10, window_bounds = array<i64: 4, 8, 32>}, {pipeline_mode = #tpu.pipeline_mode<synchronous>, transform_indices = @transform_11, window_bounds = array<i64: 1, 32>}, {pipeline_mode = #tpu.pipeline_mode<synchronous>, transform_indices = @transform_12, window_bounds = array<i64: 1, 32>}, {pipeline_mode = #tpu.pipeline_mode<synchronous>, transform_indices = @transform_13, window_bounds = array<i64: 1, 32>}, {pipeline_mode = #tpu.pipeline_mode<synchronous>, transform_indices = @transform_14, window_bounds = array<i64: 32, 128>}, {pipeline_mode = #tpu.pipeline_mode<synchronous>, transform_indices = @transform_15, window_bounds = array<i64: 1, 128>}, {pipeline_mode = #tpu.pipeline_mode<synchronous>, transform_indices = @transform_16, window_bounds = array<i64: 128, 32>}, {pipeline_mode = #tpu.pipeline_mode<synchronous>, transform_indices = @transform_17, window_bounds = array<i64: 1, 32>}, {transform_indices = @transform_18, window_bounds = array<i64: 1, 8, 32>}]} {
    %c0_i32 = arith.constant 0 : i32
    %0 = arith.cmpi eq, %arg1, %c0_i32 : i32
    %1 = arith.extui %0 : i1 to i32
    %c0_i32_0 = arith.constant 0 : i32
    %2 = arith.cmpi ne, %1, %c0_i32_0 : i32
    scf.if %2 {
      %c0_71 = arith.constant 0 : index
      %c0_72 = arith.constant 0 : index
      %c0_73 = arith.constant 0 : index
      %120 = vector.load %arg3[%c0_71, %c0_72, %c0_73] : memref<1x8x32xf32, #tpu.memory_space<vmem>>, vector<1x8x32xf32>
      %121 = vector.shape_cast %120 : vector<1x8x32xf32> to vector<8x32xf32>
      %c0_74 = arith.constant 0 : index
      %c0_75 = arith.constant 0 : index
      %122 = vector.load %arg4[%c0_74, %c0_75] : memref<1x32xf32, #tpu.memory_space<vmem>>, vector<1x32xf32>
      %c0_76 = arith.constant 0 : index
      %c0_77 = arith.constant 0 : index
      %123 = vector.load %arg5[%c0_76, %c0_77] : memref<1x32xf32, #tpu.memory_space<vmem>>, vector<1x32xf32>
      %cst_78 = arith.constant dense<0.000000e+00> : vector<8xf32>
      %124 = vector.multi_reduction <add>, %121, %cst_78 [1] : vector<8x32xf32> to vector<8xf32>
      %125 = vector.shape_cast %124 : vector<8xf32> to vector<8x1xf32>
      %cst_79 = arith.constant 3.200000e+01 : f32
      %126 = vector.broadcast %cst_79 : f32 to vector<8x1xf32>
      %127 = arith.divf %125, %126 : vector<8x1xf32>
      %128 = arith.mulf %121, %121 : vector<8x32xf32>
      %cst_80 = arith.constant dense<0.000000e+00> : vector<8xf32>
      %129 = vector.multi_reduction <add>, %128, %cst_80 [1] : vector<8x32xf32> to vector<8xf32>
      %130 = vector.shape_cast %129 : vector<8xf32> to vector<8x1xf32>
      %cst_81 = arith.constant 3.200000e+01 : f32
      %131 = vector.broadcast %cst_81 : f32 to vector<8x1xf32>
      %132 = arith.divf %130, %131 : vector<8x1xf32>
      %133 = arith.mulf %127, %127 : vector<8x1xf32>
      %134 = arith.subf %132, %133 : vector<8x1xf32>
      %135 = vector.broadcast %127 : vector<8x1xf32> to vector<8x32xf32>
      %136 = arith.subf %121, %135 : vector<8x32xf32>
      %cst_82 = arith.constant 9.99999974E-6 : f32
      %137 = vector.broadcast %cst_82 : f32 to vector<8x1xf32>
      %138 = arith.addf %134, %137 : vector<8x1xf32>
      %139 = math.rsqrt %138 : vector<8x1xf32>
      %140 = vector.broadcast %139 : vector<8x1xf32> to vector<8x32xf32>
      %141 = arith.mulf %136, %140 : vector<8x32xf32>
      %142 = vector.broadcast %122 : vector<1x32xf32> to vector<8x32xf32>
      %143 = arith.mulf %141, %142 : vector<8x32xf32>
      %144 = vector.broadcast %123 : vector<1x32xf32> to vector<8x32xf32>
      %145 = arith.addf %143, %144 : vector<8x32xf32>
      %c0_83 = arith.constant 0 : index
      %c0_84 = arith.constant 0 : index
      %146 = vector.load %arg8[%c0_83, %c0_84] : memref<32x32xf32, #tpu.memory_space<vmem>>, vector<32x32xf32>
      %cst_85 = arith.constant dense<0.000000e+00> : vector<8x32xf32>
      %147 = tpu.matmul %145, %146, %cst_85 {dimension_numbers = #tpu.dot_dimension_numbers<[1], [0], [0], [1], [0, 0, 1, 1], [], []>} : vector<8x32xf32>, vector<32x32xf32>, vector<8x32xf32> -> vector<8x32xf32>
      %c0_86 = arith.constant 0 : index
      %c0_87 = arith.constant 0 : index
      %148 = vector.load %arg9[%c0_86, %c0_87] : memref<1x32xf32, #tpu.memory_space<vmem>>, vector<1x32xf32>
      %149 = vector.broadcast %148 : vector<1x32xf32> to vector<8x32xf32>
      %150 = arith.addf %147, %149 : vector<8x32xf32>
      %c0_88 = arith.constant 0 : index
      %c0_89 = arith.constant 0 : index
      %151 = vector.load %arg10[%c0_88, %c0_89] : memref<32x32xf32, #tpu.memory_space<vmem>>, vector<32x32xf32>
      %cst_90 = arith.constant dense<0.000000e+00> : vector<8x32xf32>
      %152 = tpu.matmul %145, %151, %cst_90 {dimension_numbers = #tpu.dot_dimension_numbers<[1], [0], [0], [1], [0, 0, 1, 1], [], []>} : vector<8x32xf32>, vector<32x32xf32>, vector<8x32xf32> -> vector<8x32xf32>
      %c0_91 = arith.constant 0 : index
      %c0_92 = arith.constant 0 : index
      %153 = vector.load %arg11[%c0_91, %c0_92] : memref<1x32xf32, #tpu.memory_space<vmem>>, vector<1x32xf32>
      %154 = vector.broadcast %153 : vector<1x32xf32> to vector<8x32xf32>
      %155 = arith.addf %152, %154 : vector<8x32xf32>
      %156 = vector.extract_strided_slice %150 {offsets = [0, 0], sizes = [8, 8], strides = [1, 1]} : vector<8x32xf32> to vector<8x8xf32>
      %c0_93 = arith.constant 0 : index
      %c0_94 = arith.constant 0 : index
      %c0_95 = arith.constant 0 : index
      %157 = vector.load %arg21[%c0_93, %c0_94, %c0_95] : memref<4x8x8xf32, #tpu.memory_space<vmem>>, vector<1x8x8xf32>
      %158 = vector.shape_cast %157 : vector<1x8x8xf32> to vector<8x8xf32>
      %159 = vector.shape_cast %156 : vector<8x8xf32> to vector<1x8x8xf32>
      tpu.vector_store %arg21[%c0_93, %c0_94, %c0_95], %159 {strides = array<i32>} : memref<4x8x8xf32, #tpu.memory_space<vmem>>, vector<1x8x8xf32>,
      %160 = vector.extract_strided_slice %155 {offsets = [0, 0], sizes = [8, 8], strides = [1, 1]} : vector<8x32xf32> to vector<8x8xf32>
      %c0_96 = arith.constant 0 : index
      %c0_97 = arith.constant 0 : index
      %c0_98 = arith.constant 0 : index
      %161 = vector.load %arg22[%c0_96, %c0_97, %c0_98] : memref<4x8x8xf32, #tpu.memory_space<vmem>>, vector<1x8x8xf32>
      %162 = vector.shape_cast %161 : vector<1x8x8xf32> to vector<8x8xf32>
      %163 = vector.shape_cast %160 : vector<8x8xf32> to vector<1x8x8xf32>
      tpu.vector_store %arg22[%c0_96, %c0_97, %c0_98], %163 {strides = array<i32>} : memref<4x8x8xf32, #tpu.memory_space<vmem>>, vector<1x8x8xf32>,
      %164 = vector.extract_strided_slice %150 {offsets = [0, 8], sizes = [8, 8], strides = [1, 1]} : vector<8x32xf32> to vector<8x8xf32>
      %c1_99 = arith.constant 1 : index
      %c0_100 = arith.constant 0 : index
      %c0_101 = arith.constant 0 : index
      %165 = vector.load %arg21[%c1_99, %c0_100, %c0_101] : memref<4x8x8xf32, #tpu.memory_space<vmem>>, vector<1x8x8xf32>
      %166 = vector.shape_cast %165 : vector<1x8x8xf32> to vector<8x8xf32>
      %167 = vector.shape_cast %164 : vector<8x8xf32> to vector<1x8x8xf32>
      tpu.vector_store %arg21[%c1_99, %c0_100, %c0_101], %167 {strides = array<i32>} : memref<4x8x8xf32, #tpu.memory_space<vmem>>, vector<1x8x8xf32>,
      %168 = vector.extract_strided_slice %155 {offsets = [0, 8], sizes = [8, 8], strides = [1, 1]} : vector<8x32xf32> to vector<8x8xf32>
      %c1_102 = arith.constant 1 : index
      %c0_103 = arith.constant 0 : index
      %c0_104 = arith.constant 0 : index
      %169 = vector.load %arg22[%c1_102, %c0_103, %c0_104] : memref<4x8x8xf32, #tpu.memory_space<vmem>>, vector<1x8x8xf32>
      %170 = vector.shape_cast %169 : vector<1x8x8xf32> to vector<8x8xf32>
      %171 = vector.shape_cast %168 : vector<8x8xf32> to vector<1x8x8xf32>
      tpu.vector_store %arg22[%c1_102, %c0_103, %c0_104], %171 {strides = array<i32>} : memref<4x8x8xf32, #tpu.memory_space<vmem>>, vector<1x8x8xf32>,
      %172 = vector.extract_strided_slice %150 {offsets = [0, 16], sizes = [8, 8], strides = [1, 1]} : vector<8x32xf32> to vector<8x8xf32>
      %c2_105 = arith.constant 2 : index
      %c0_106 = arith.constant 0 : index
      %c0_107 = arith.constant 0 : index
      %173 = vector.load %arg21[%c2_105, %c0_106, %c0_107] : memref<4x8x8xf32, #tpu.memory_space<vmem>>, vector<1x8x8xf32>
      %174 = vector.shape_cast %173 : vector<1x8x8xf32> to vector<8x8xf32>
      %175 = vector.shape_cast %172 : vector<8x8xf32> to vector<1x8x8xf32>
      tpu.vector_store %arg21[%c2_105, %c0_106, %c0_107], %175 {strides = array<i32>} : memref<4x8x8xf32, #tpu.memory_space<vmem>>, vector<1x8x8xf32>,
      %176 = vector.extract_strided_slice %155 {offsets = [0, 16], sizes = [8, 8], strides = [1, 1]} : vector<8x32xf32> to vector<8x8xf32>
      %c2_108 = arith.constant 2 : index
      %c0_109 = arith.constant 0 : index
      %c0_110 = arith.constant 0 : index
      %177 = vector.load %arg22[%c2_108, %c0_109, %c0_110] : memref<4x8x8xf32, #tpu.memory_space<vmem>>, vector<1x8x8xf32>
      %178 = vector.shape_cast %177 : vector<1x8x8xf32> to vector<8x8xf32>
      %179 = vector.shape_cast %176 : vector<8x8xf32> to vector<1x8x8xf32>
      tpu.vector_store %arg22[%c2_108, %c0_109, %c0_110], %179 {strides = array<i32>} : memref<4x8x8xf32, #tpu.memory_space<vmem>>, vector<1x8x8xf32>,
      %180 = vector.extract_strided_slice %150 {offsets = [0, 24], sizes = [8, 8], strides = [1, 1]} : vector<8x32xf32> to vector<8x8xf32>
      %c3_111 = arith.constant 3 : index
      %c0_112 = arith.constant 0 : index
      %c0_113 = arith.constant 0 : index
      %181 = vector.load %arg21[%c3_111, %c0_112, %c0_113] : memref<4x8x8xf32, #tpu.memory_space<vmem>>, vector<1x8x8xf32>
      %182 = vector.shape_cast %181 : vector<1x8x8xf32> to vector<8x8xf32>
      %183 = vector.shape_cast %180 : vector<8x8xf32> to vector<1x8x8xf32>
      tpu.vector_store %arg21[%c3_111, %c0_112, %c0_113], %183 {strides = array<i32>} : memref<4x8x8xf32, #tpu.memory_space<vmem>>, vector<1x8x8xf32>,
      %184 = vector.extract_strided_slice %155 {offsets = [0, 24], sizes = [8, 8], strides = [1, 1]} : vector<8x32xf32> to vector<8x8xf32>
      %c3_114 = arith.constant 3 : index
      %c0_115 = arith.constant 0 : index
      %c0_116 = arith.constant 0 : index
      %185 = vector.load %arg22[%c3_114, %c0_115, %c0_116] : memref<4x8x8xf32, #tpu.memory_space<vmem>>, vector<1x8x8xf32>
      %186 = vector.shape_cast %185 : vector<1x8x8xf32> to vector<8x8xf32>
      %187 = vector.shape_cast %184 : vector<8x8xf32> to vector<1x8x8xf32>
      tpu.vector_store %arg22[%c3_114, %c0_115, %c0_116], %187 {strides = array<i32>} : memref<4x8x8xf32, #tpu.memory_space<vmem>>, vector<1x8x8xf32>,
    } else {
    }
    %c0 = arith.constant 0 : index
    %c0_1 = arith.constant 0 : index
    %c0_2 = arith.constant 0 : index
    %3 = vector.load %arg2[%c0, %c0_1, %c0_2] : memref<1x8x32xf32, #tpu.memory_space<vmem>>, vector<1x8x32xf32>
    %4 = vector.shape_cast %3 : vector<1x8x32xf32> to vector<8x32xf32>
    %c0_3 = arith.constant 0 : index
    %c0_4 = arith.constant 0 : index
    %5 = vector.load %arg4[%c0_3, %c0_4] : memref<1x32xf32, #tpu.memory_space<vmem>>, vector<1x32xf32>
    %c0_5 = arith.constant 0 : index
    %c0_6 = arith.constant 0 : index
    %6 = vector.load %arg5[%c0_5, %c0_6] : memref<1x32xf32, #tpu.memory_space<vmem>>, vector<1x32xf32>
    %cst = arith.constant dense<0.000000e+00> : vector<8xf32>
    %7 = vector.multi_reduction <add>, %4, %cst [1] : vector<8x32xf32> to vector<8xf32>
    %8 = vector.shape_cast %7 : vector<8xf32> to vector<8x1xf32>
    %cst_7 = arith.constant 3.200000e+01 : f32
    %9 = vector.broadcast %cst_7 : f32 to vector<8x1xf32>
    %10 = arith.divf %8, %9 : vector<8x1xf32>
    %11 = arith.mulf %4, %4 : vector<8x32xf32>
    %cst_8 = arith.constant dense<0.000000e+00> : vector<8xf32>
    %12 = vector.multi_reduction <add>, %11, %cst_8 [1] : vector<8x32xf32> to vector<8xf32>
    %13 = vector.shape_cast %12 : vector<8xf32> to vector<8x1xf32>
    %cst_9 = arith.constant 3.200000e+01 : f32
    %14 = vector.broadcast %cst_9 : f32 to vector<8x1xf32>
    %15 = arith.divf %13, %14 : vector<8x1xf32>
    %16 = arith.mulf %10, %10 : vector<8x1xf32>
    %17 = arith.subf %15, %16 : vector<8x1xf32>
    %18 = vector.broadcast %10 : vector<8x1xf32> to vector<8x32xf32>
    %19 = arith.subf %4, %18 : vector<8x32xf32>
    %cst_10 = arith.constant 9.99999974E-6 : f32
    %20 = vector.broadcast %cst_10 : f32 to vector<8x1xf32>
    %21 = arith.addf %17, %20 : vector<8x1xf32>
    %22 = math.rsqrt %21 : vector<8x1xf32>
    %23 = vector.broadcast %22 : vector<8x1xf32> to vector<8x32xf32>
    %24 = arith.mulf %19, %23 : vector<8x32xf32>
    %25 = vector.broadcast %5 : vector<1x32xf32> to vector<8x32xf32>
    %26 = arith.mulf %24, %25 : vector<8x32xf32>
    %27 = vector.broadcast %6 : vector<1x32xf32> to vector<8x32xf32>
    %28 = arith.addf %26, %27 : vector<8x32xf32>
    %c0_11 = arith.constant 0 : index
    %c0_12 = arith.constant 0 : index
    %29 = vector.load %arg6[%c0_11, %c0_12] : memref<32x32xf32, #tpu.memory_space<vmem>>, vector<32x32xf32>
    %cst_13 = arith.constant dense<0.000000e+00> : vector<8x32xf32>
    %30 = tpu.matmul %28, %29, %cst_13 {dimension_numbers = #tpu.dot_dimension_numbers<[1], [0], [0], [1], [0, 0, 1, 1], [], []>} : vector<8x32xf32>, vector<32x32xf32>, vector<8x32xf32> -> vector<8x32xf32>
    %c0_14 = arith.constant 0 : index
    %c0_15 = arith.constant 0 : index
    %31 = vector.load %arg7[%c0_14, %c0_15] : memref<1x32xf32, #tpu.memory_space<vmem>>, vector<1x32xf32>
    %32 = vector.broadcast %31 : vector<1x32xf32> to vector<8x32xf32>
    %33 = arith.addf %30, %32 : vector<8x32xf32>
    %34 = vector.extract_strided_slice %33 {offsets = [0, 0], sizes = [8, 8], strides = [1, 1]} : vector<8x32xf32> to vector<8x8xf32>
    %c0_16 = arith.constant 0 : index
    %c0_17 = arith.constant 0 : index
    %c0_18 = arith.constant 0 : index
    %35 = vector.load %arg23[%c0_16, %c0_17, %c0_18] : memref<4x8x8xf32, #tpu.memory_space<vmem>>, vector<1x8x8xf32>
    %36 = vector.shape_cast %35 : vector<1x8x8xf32> to vector<8x8xf32>
    %37 = vector.shape_cast %34 : vector<8x8xf32> to vector<1x8x8xf32>
    tpu.vector_store %arg23[%c0_16, %c0_17, %c0_18], %37 {strides = array<i32>} : memref<4x8x8xf32, #tpu.memory_space<vmem>>, vector<1x8x8xf32>,
    %38 = vector.extract_strided_slice %33 {offsets = [0, 8], sizes = [8, 8], strides = [1, 1]} : vector<8x32xf32> to vector<8x8xf32>
    %c1 = arith.constant 1 : index
    %c0_19 = arith.constant 0 : index
    %c0_20 = arith.constant 0 : index
    %39 = vector.load %arg23[%c1, %c0_19, %c0_20] : memref<4x8x8xf32, #tpu.memory_space<vmem>>, vector<1x8x8xf32>
    %40 = vector.shape_cast %39 : vector<1x8x8xf32> to vector<8x8xf32>
    %41 = vector.shape_cast %38 : vector<8x8xf32> to vector<1x8x8xf32>
    tpu.vector_store %arg23[%c1, %c0_19, %c0_20], %41 {strides = array<i32>} : memref<4x8x8xf32, #tpu.memory_space<vmem>>, vector<1x8x8xf32>,
    %42 = vector.extract_strided_slice %33 {offsets = [0, 16], sizes = [8, 8], strides = [1, 1]} : vector<8x32xf32> to vector<8x8xf32>
    %c2 = arith.constant 2 : index
    %c0_21 = arith.constant 0 : index
    %c0_22 = arith.constant 0 : index
    %43 = vector.load %arg23[%c2, %c0_21, %c0_22] : memref<4x8x8xf32, #tpu.memory_space<vmem>>, vector<1x8x8xf32>
    %44 = vector.shape_cast %43 : vector<1x8x8xf32> to vector<8x8xf32>
    %45 = vector.shape_cast %42 : vector<8x8xf32> to vector<1x8x8xf32>
    tpu.vector_store %arg23[%c2, %c0_21, %c0_22], %45 {strides = array<i32>} : memref<4x8x8xf32, #tpu.memory_space<vmem>>, vector<1x8x8xf32>,
    %46 = vector.extract_strided_slice %33 {offsets = [0, 24], sizes = [8, 8], strides = [1, 1]} : vector<8x32xf32> to vector<8x8xf32>
    %c3 = arith.constant 3 : index
    %c0_23 = arith.constant 0 : index
    %c0_24 = arith.constant 0 : index
    %47 = vector.load %arg23[%c3, %c0_23, %c0_24] : memref<4x8x8xf32, #tpu.memory_space<vmem>>, vector<1x8x8xf32>
    %48 = vector.shape_cast %47 : vector<1x8x8xf32> to vector<8x8xf32>
    %49 = vector.shape_cast %46 : vector<8x8xf32> to vector<1x8x8xf32>
    tpu.vector_store %arg23[%c3, %c0_23, %c0_24], %49 {strides = array<i32>} : memref<4x8x8xf32, #tpu.memory_space<vmem>>, vector<1x8x8xf32>,
    %c0_25 = arith.constant 0 : index
    %c0_26 = arith.constant 0 : index
    %c0_27 = arith.constant 0 : index
    %50 = vector.load %arg23[%c0_25, %c0_26, %c0_27] : memref<4x8x8xf32, #tpu.memory_space<vmem>>, vector<4x8x8xf32>
    %c0_28 = arith.constant 0 : index
    %c0_29 = arith.constant 0 : index
    %c0_30 = arith.constant 0 : index
    %51 = vector.load %arg21[%c0_28, %c0_29, %c0_30] : memref<4x8x8xf32, #tpu.memory_space<vmem>>, vector<4x8x8xf32>
    %c0_31 = arith.constant 0 : index
    %c0_32 = arith.constant 0 : index
    %c0_33 = arith.constant 0 : index
    %52 = vector.load %arg22[%c0_31, %c0_32, %c0_33] : memref<4x8x8xf32, #tpu.memory_space<vmem>>, vector<4x8x8xf32>
    "tpu.trace_start"() <{level = 10 : i32, message = "hqd,hkd->hqk"}> : () -> ()
    %cst_34 = arith.constant dense<0.000000e+00> : vector<4x8x8xf32>
    %53 = tpu.matmul %50, %51, %cst_34 {dimension_numbers = #tpu.dot_dimension_numbers<[2], [2], [1], [1], [0, 0, 0, 1, 1, 1], [0], [0]>} : vector<4x8x8xf32>, vector<4x8x8xf32>, vector<4x8x8xf32> -> vector<4x8x8xf32>
    "tpu.trace_stop"() : () -> ()
    %cst_35 = arith.constant 0.353553385 : f32
    %54 = vector.broadcast %cst_35 : f32 to vector<4x8x8xf32>
    %55 = arith.mulf %53, %54 : vector<4x8x8xf32>
    %cst_36 = arith.constant dense<0xFF800000> : vector<4x8xf32>
    %56 = vector.multi_reduction <maximumf>, %55, %cst_36 [2] : vector<4x8x8xf32> to vector<4x8xf32>
    %57 = vector.shape_cast %56 : vector<4x8xf32> to vector<4x8x1xf32>
    %58 = vector.broadcast %57 : vector<4x8x1xf32> to vector<4x8x8xf32>
    %59 = arith.subf %55, %58 : vector<4x8x8xf32>
    %60 = math.exp %59 : vector<4x8x8xf32>
    %cst_37 = arith.constant dense<0.000000e+00> : vector<4x8xf32>
    %61 = vector.multi_reduction <add>, %60, %cst_37 [2] : vector<4x8x8xf32> to vector<4x8xf32>
    %62 = vector.shape_cast %61 : vector<4x8xf32> to vector<4x8x1xf32>
    %63 = tpu.reciprocal %62 {approx = true} : vector<4x8x1xf32> -> vector<4x8x1xf32>
    %64 = vector.broadcast %63 : vector<4x8x1xf32> to vector<4x8x8xf32>
    %65 = arith.mulf %60, %64 : vector<4x8x8xf32>
    "tpu.trace_start"() <{level = 10 : i32, message = "hqk,hkd->hqd"}> : () -> ()
    %cst_38 = arith.constant dense<0.000000e+00> : vector<4x8x8xf32>
    %66 = tpu.matmul %65, %52, %cst_38 {dimension_numbers = #tpu.dot_dimension_numbers<[2], [1], [1], [2], [0, 0, 0, 1, 1, 2], [0], [0]>} : vector<4x8x8xf32>, vector<4x8x8xf32>, vector<4x8x8xf32> -> vector<4x8x8xf32>
    "tpu.trace_stop"() : () -> ()
    %c0_39 = arith.constant 0 : index
    %c0_40 = arith.constant 0 : index
    %c0_41 = arith.constant 0 : index
    %67 = vector.load %arg12[%c0_39, %c0_40, %c0_41] : memref<4x8x32xf32, #tpu.memory_space<vmem>>, vector<4x8x32xf32>
    "tpu.trace_start"() <{level = 10 : i32, message = "hqd,hde->hqe"}> : () -> ()
    %cst_42 = arith.constant dense<0.000000e+00> : vector<4x8x32xf32>
    %68 = tpu.matmul %66, %67, %cst_42 {dimension_numbers = #tpu.dot_dimension_numbers<[2], [1], [1], [2], [0, 0, 0, 1, 1, 2], [0], [0]>} : vector<4x8x8xf32>, vector<4x8x32xf32>, vector<4x8x32xf32> -> vector<4x8x32xf32>
    "tpu.trace_stop"() : () -> ()
    %cst_43 = arith.constant dense<0.000000e+00> : vector<8x32xf32>
    %69 = vector.multi_reduction <add>, %68, %cst_43 [0] : vector<4x8x32xf32> to vector<8x32xf32>
    %c0_44 = arith.constant 0 : index
    %c0_45 = arith.constant 0 : index
    %70 = vector.load %arg13[%c0_44, %c0_45] : memref<1x32xf32, #tpu.memory_space<vmem>>, vector<1x32xf32>
    %71 = vector.broadcast %70 : vector<1x32xf32> to vector<8x32xf32>
    %72 = arith.addf %69, %71 : vector<8x32xf32>
    %73 = arith.addf %4, %72 : vector<8x32xf32>
    %c0_46 = arith.constant 0 : index
    %c0_47 = arith.constant 0 : index
    %74 = vector.load %arg14[%c0_46, %c0_47] : memref<1x32xf32, #tpu.memory_space<vmem>>, vector<1x32xf32>
    %c0_48 = arith.constant 0 : index
    %c0_49 = arith.constant 0 : index
    %75 = vector.load %arg15[%c0_48, %c0_49] : memref<1x32xf32, #tpu.memory_space<vmem>>, vector<1x32xf32>
    %cst_50 = arith.constant dense<0.000000e+00> : vector<8xf32>
    %76 = vector.multi_reduction <add>, %73, %cst_50 [1] : vector<8x32xf32> to vector<8xf32>
    %77 = vector.shape_cast %76 : vector<8xf32> to vector<8x1xf32>
    %cst_51 = arith.constant 3.200000e+01 : f32
    %78 = vector.broadcast %cst_51 : f32 to vector<8x1xf32>
    %79 = arith.divf %77, %78 : vector<8x1xf32>
    %80 = arith.mulf %73, %73 : vector<8x32xf32>
    %cst_52 = arith.constant dense<0.000000e+00> : vector<8xf32>
    %81 = vector.multi_reduction <add>, %80, %cst_52 [1] : vector<8x32xf32> to vector<8xf32>
    %82 = vector.shape_cast %81 : vector<8xf32> to vector<8x1xf32>
    %cst_53 = arith.constant 3.200000e+01 : f32
    %83 = vector.broadcast %cst_53 : f32 to vector<8x1xf32>
    %84 = arith.divf %82, %83 : vector<8x1xf32>
    %85 = arith.mulf %79, %79 : vector<8x1xf32>
    %86 = arith.subf %84, %85 : vector<8x1xf32>
    %87 = vector.broadcast %79 : vector<8x1xf32> to vector<8x32xf32>
    %88 = arith.subf %73, %87 : vector<8x32xf32>
    %cst_54 = arith.constant 9.99999974E-6 : f32
    %89 = vector.broadcast %cst_54 : f32 to vector<8x1xf32>
    %90 = arith.addf %86, %89 : vector<8x1xf32>
    %91 = math.rsqrt %90 : vector<8x1xf32>
    %92 = vector.broadcast %91 : vector<8x1xf32> to vector<8x32xf32>
    %93 = arith.mulf %88, %92 : vector<8x32xf32>
    %94 = vector.broadcast %74 : vector<1x32xf32> to vector<8x32xf32>
    %95 = arith.mulf %93, %94 : vector<8x32xf32>
    %96 = vector.broadcast %75 : vector<1x32xf32> to vector<8x32xf32>
    %97 = arith.addf %95, %96 : vector<8x32xf32>
    %c0_55 = arith.constant 0 : index
    %c0_56 = arith.constant 0 : index
    %98 = vector.load %arg16[%c0_55, %c0_56] : memref<32x128xf32, #tpu.memory_space<vmem>>, vector<32x128xf32>
    %cst_57 = arith.constant dense<0.000000e+00> : vector<8x128xf32>
    %99 = tpu.matmul %97, %98, %cst_57 {dimension_numbers = #tpu.dot_dimension_numbers<[1], [0], [0], [1], [0, 0, 1, 1], [], []>} : vector<8x32xf32>, vector<32x128xf32>, vector<8x128xf32> -> vector<8x128xf32>
    %c0_58 = arith.constant 0 : index
    %c0_59 = arith.constant 0 : index
    %100 = vector.load %arg17[%c0_58, %c0_59] : memref<1x128xf32, #tpu.memory_space<vmem>>, vector<1x128xf32>
    %101 = vector.broadcast %100 : vector<1x128xf32> to vector<8x128xf32>
    %102 = arith.addf %99, %101 : vector<8x128xf32>
    %cst_60 = arith.constant 5.000000e-01 : f32
    %103 = vector.broadcast %cst_60 : f32 to vector<8x128xf32>
    %104 = arith.mulf %103, %102 : vector<8x128xf32>
    %cst_61 = arith.constant 0.707106769 : f32
    %105 = vector.broadcast %cst_61 : f32 to vector<8x128xf32>
    %106 = arith.mulf %102, %105 : vector<8x128xf32>
    %107 = math.erf %106 : vector<8x128xf32>
    %cst_62 = arith.constant 1.000000e+00 : f32
    %108 = vector.broadcast %cst_62 : f32 to vector<8x128xf32>
    %109 = arith.addf %108, %107 : vector<8x128xf32>
    %110 = arith.mulf %104, %109 : vector<8x128xf32>
    %c0_63 = arith.constant 0 : index
    %c0_64 = arith.constant 0 : index
    %111 = vector.load %arg18[%c0_63, %c0_64] : memref<128x32xf32, #tpu.memory_space<vmem>>, vector<128x32xf32>
    %cst_65 = arith.constant dense<0.000000e+00> : vector<8x32xf32>
    %112 = tpu.matmul %110, %111, %cst_65 {dimension_numbers = #tpu.dot_dimension_numbers<[1], [0], [0], [1], [0, 0, 1, 1], [], []>} : vector<8x128xf32>, vector<128x32xf32>, vector<8x32xf32> -> vector<8x32xf32>
    %c0_66 = arith.constant 0 : index
    %c0_67 = arith.constant 0 : index
    %113 = vector.load %arg19[%c0_66, %c0_67] : memref<1x32xf32, #tpu.memory_space<vmem>>, vector<1x32xf32>
    %114 = vector.broadcast %113 : vector<1x32xf32> to vector<8x32xf32>
    %115 = arith.addf %112, %114 : vector<8x32xf32>
    %116 = arith.addf %73, %115 : vector<8x32xf32>
    %c0_68 = arith.constant 0 : index
    %c0_69 = arith.constant 0 : index
    %c0_70 = arith.constant 0 : index
    %117 = vector.load %arg20[%c0_68, %c0_69, %c0_70] : memref<1x8x32xf32, #tpu.memory_space<vmem>>, vector<1x8x32xf32>
    %118 = vector.shape_cast %117 : vector<1x8x32xf32> to vector<8x32xf32>
    %119 = vector.shape_cast %116 : vector<8x32xf32> to vector<1x8x32xf32>
    tpu.vector_store %arg20[%c0_68, %c0_69, %c0_70], %119 {strides = array<i32>} : memref<1x8x32xf32, #tpu.memory_space<vmem>>, vector<1x8x32xf32>,
    return
  }
  func.func @transform_0(%arg0: i32, %arg1: i32) -> (i32, i32, i32) {
    %c0_i32 = arith.constant 0 : i32
    %c0_i32_0 = arith.constant 0 : i32
    return %arg0, %arg1, %c0_i32 : i32, i32, i32
  }
  func.func @transform_1(%arg0: i32, %arg1: i32) -> (i32, i32, i32) {
    %c0_i32 = arith.constant 0 : i32
    %c0_i32_0 = arith.constant 0 : i32
    %c0_i32_1 = arith.constant 0 : i32
    return %arg0, %c0_i32, %c0_i32_0 : i32, i32, i32
  }
  func.func @transform_2(%arg0: i32, %arg1: i32) -> (i32, i32) {
    %c0_i32 = arith.constant 0 : i32
    %c0_i32_0 = arith.constant 0 : i32
    %c0_i32_1 = arith.constant 0 : i32
    return %c0_i32, %c0_i32_0 : i32, i32
  }
  func.func @transform_3(%arg0: i32, %arg1: i32) -> (i32, i32) {
    %c0_i32 = arith.constant 0 : i32
    %c0_i32_0 = arith.constant 0 : i32
    %c0_i32_1 = arith.constant 0 : i32
    return %c0_i32, %c0_i32_0 : i32, i32
  }
  func.func @transform_4(%arg0: i32, %arg1: i32) -> (i32, i32) {
    %c0_i32 = arith.constant 0 : i32
    %c0_i32_0 = arith.constant 0 : i32
    %c0_i32_1 = arith.constant 0 : i32
    return %c0_i32, %c0_i32_0 : i32, i32
  }
  func.func @transform_5(%arg0: i32, %arg1: i32) -> (i32, i32) {
    %c0_i32 = arith.constant 0 : i32
    %c0_i32_0 = arith.constant 0 : i32
    %c0_i32_1 = arith.constant 0 : i32
    return %c0_i32, %c0_i32_0 : i32, i32
  }
  func.func @transform_6(%arg0: i32, %arg1: i32) -> (i32, i32) {
    %c0_i32 = arith.constant 0 : i32
    %c0_i32_0 = arith.constant 0 : i32
    %c0_i32_1 = arith.constant 0 : i32
    return %c0_i32, %c0_i32_0 : i32, i32
  }
  func.func @transform_7(%arg0: i32, %arg1: i32) -> (i32, i32) {
    %c0_i32 = arith.constant 0 : i32
    %c0_i32_0 = arith.constant 0 : i32
    %c0_i32_1 = arith.constant 0 : i32
    return %c0_i32, %c0_i32_0 : i32, i32
  }
  func.func @transform_8(%arg0: i32, %arg1: i32) -> (i32, i32) {
    %c0_i32 = arith.constant 0 : i32
    %c0_i32_0 = arith.constant 0 : i32
    %c0_i32_1 = arith.constant 0 : i32
    return %c0_i32, %c0_i32_0 : i32, i32
  }
  func.func @transform_9(%arg0: i32, %arg1: i32) -> (i32, i32) {
    %c0_i32 = arith.constant 0 : i32
    %c0_i32_0 = arith.constant 0 : i32
    %c0_i32_1 = arith.constant 0 : i32
    return %c0_i32, %c0_i32_0 : i32, i32
  }
  func.func @transform_10(%arg0: i32, %arg1: i32) -> (i32, i32, i32) {
    %c0_i32 = arith.constant 0 : i32
    %c0_i32_0 = arith.constant 0 : i32
    %c0_i32_1 = arith.constant 0 : i32
    %c0_i32_2 = arith.constant 0 : i32
    return %c0_i32, %c0_i32_0, %c0_i32_1 : i32, i32, i32
  }
  func.func @transform_11(%arg0: i32, %arg1: i32) -> (i32, i32) {
    %c0_i32 = arith.constant 0 : i32
    %c0_i32_0 = arith.constant 0 : i32
    %c0_i32_1 = arith.constant 0 : i32
    return %c0_i32, %c0_i32_0 : i32, i32
  }
  func.func @transform_12(%arg0: i32, %arg1: i32) -> (i32, i32) {
    %c0_i32 = arith.constant 0 : i32
    %c0_i32_0 = arith.constant 0 : i32
    %c0_i32_1 = arith.constant 0 : i32
    return %c0_i32, %c0_i32_0 : i32, i32
  }
  func.func @transform_13(%arg0: i32, %arg1: i32) -> (i32, i32) {
    %c0_i32 = arith.constant 0 : i32
    %c0_i32_0 = arith.constant 0 : i32
    %c0_i32_1 = arith.constant 0 : i32
    return %c0_i32, %c0_i32_0 : i32, i32
  }
  func.func @transform_14(%arg0: i32, %arg1: i32) -> (i32, i32) {
    %c0_i32 = arith.constant 0 : i32
    %c0_i32_0 = arith.constant 0 : i32
    %c0_i32_1 = arith.constant 0 : i32
    return %c0_i32, %c0_i32_0 : i32, i32
  }
  func.func @transform_15(%arg0: i32, %arg1: i32) -> (i32, i32) {
    %c0_i32 = arith.constant 0 : i32
    %c0_i32_0 = arith.constant 0 : i32
    %c0_i32_1 = arith.constant 0 : i32
    return %c0_i32, %c0_i32_0 : i32, i32
  }
  func.func @transform_16(%arg0: i32, %arg1: i32) -> (i32, i32) {
    %c0_i32 = arith.constant 0 : i32
    %c0_i32_0 = arith.constant 0 : i32
    %c0_i32_1 = arith.constant 0 : i32
    return %c0_i32, %c0_i32_0 : i32, i32
  }
  func.func @transform_17(%arg0: i32, %arg1: i32) -> (i32, i32) {
    %c0_i32 = arith.constant 0 : i32
    %c0_i32_0 = arith.constant 0 : i32
    %c0_i32_1 = arith.constant 0 : i32
    return %c0_i32, %c0_i32_0 : i32, i32
  }
  func.func @transform_18(%arg0: i32, %arg1: i32) -> (i32, i32, i32) {
    %c0_i32 = arith.constant 0 : i32
    %c0_i32_0 = arith.constant 0 : i32
    return %arg0, %arg1, %c0_i32 : i32, i32, i32
  }
}

</mosaic_0001>

<bundles_post_ra>
// kernel: tpu_custom_call.1
= control target key start
LH: loop header
LB: loop body
LE: loop exit
PB: predicated region body
PF: predicated region fallthrough
CT: control target
= control target key end

     0   :  { %s3371_s0 = inlined_call_operand.hbm [shape: f32[2,8,32], index: 0, kind: input, shape index: {}]   ;;  %s3372_s1 = inlined_call_operand.hbm [shape: f32[2,8,32], index: 1, kind: input, shape index: {}]   ;;  %s3373_s2 = inlined_call_operand.vmem [shape: f32[1,32], index: 2, kind: input, shape index: {}]   ;;  %s3374_s3 = inlined_call_operand.vmem [shape: f32[1,32], index: 3, kind: input, shape index: {}]   ;;  %s3375_s4 = inlined_call_operand.vmem [shape: f32[32,32], index: 4, kind: input, shape index: {}]   ;;  %s3376_s5 = inlined_call_operand.vmem [shape: f32[1,32], index: 5, kind: input, shape index: {}]   ;;  %s3377_s6 = inlined_call_operand.vmem [shape: f32[32,32], index: 6, kind: input, shape index: {}]   ;;  %s3378_s7 = inlined_call_operand.vmem [shape: f32[1,32], index: 7, kind: input, shape index: {}]   ;;  %s3379_s8 = inlined_call_operand.vmem [shape: f32[32,32], index: 8, kind: input, shape index: {}]   ;;  %s3380_s9 = inlined_call_operand.vmem [shape: f32[1,32], index: 9, kind: input, shape index: {}]   ;;  %s3381_s10 = inlined_call_operand.vmem [shape: f32[4,8,32], index: 10, kind: input, shape index: {}]   ;;  %s3382_s11 = inlined_call_operand.vmem [shape: f32[1,32], index: 11, kind: input, shape index: {}]   ;;  %s3383_s12 = inlined_call_operand.vmem [shape: f32[1,32], index: 12, kind: input, shape index: {}]   ;;  %s3384_s13 = inlined_call_operand.vmem [shape: f32[1,32], index: 13, kind: input, shape index: {}]   ;;  %s3385_s14 = inlined_call_operand.vmem [shape: f32[32,128], index: 14, kind: input, shape index: {}]   ;;  %s3386_s15 = inlined_call_operand.vmem [shape: f32[1,128], index: 15, kind: input, shape index: {}]   ;;  %s3387_s16 = inlined_call_operand.vmem [shape: f32[128,32], index: 16, kind: input, shape index: {}]   ;;  %s3388_s17 = inlined_call_operand.vmem [shape: f32[1,32], index: 17, kind: input, shape index: {}]   ;;  %s3389_s18 = inlined_call_operand.hbm [shape: f32[2,8,32], index: 18, kind: output, shape index: {}]  }
   0x1   :  { %3398 = sst [smem:[#allocation22_spill]] %s3371_s0 }
   0x2   :  { %3399 = sst [smem:[#allocation23_spill]] %s3372_s1 }
   0x3   :  { %3400 = sst [smem:[#allocation24_spill]] %s3373_s2 }
   0x4   :  { %3401 = sst [smem:[#allocation25_spill]] %s3384_s13 }
   0x5   :  { %3402 = sst [smem:[#allocation26_spill]] %s3386_s15 }
   0x6   :  { %3403 = sst [smem:[#allocation27_spill]] %s3388_s17 }
   0x7   :  { %3404 = sst [smem:[#allocation28_spill]] %s3389_s18 }
   0x8   :  { %23 = vsyncpa [#allocation6], 0 }
   0x9   :  { %25 = vsyncpa [#allocation6 + $0x1], 0 }
   0xa   :  { %26 = vsyncpa [#allocation9], 0 }
   0xb   :  { %28 = vsyncpa [#allocation9 + $0x1], 0 }
   0xc   :  { %29 = vsyncpa [#allocation7], 0 }
   0xd   :  { %31 = vsyncpa [#allocation7 + $0x1], 0  ;;  %s2909_s27 = smov 0   ;;  %s2911_s28 = smov 0  }
   0xe   :  { %s2913_s29 = smov 0   ;;  %s2915_s30 = smov 0  }
   0xf   :  { %s2917_s0 = smov 0   ;;  %s2919_s19 = smov 0  }
  0x10 LB: > { %3405 = sst [smem:[#allocation14_spill]] %s2784_s27  ;;  %s2320_s1 = sadd.s32 4294967295, %s2804_s19   ;;  %s2804_s19 = sphi %s2919_s19, %s37_s19   ;;  %s2800_s0 = sphi %s2917_s0, %s3434_s0   ;;  %s2796_s30 = sphi %s2915_s30, %s3433_s30   ;;  %s2792_s29 = sphi %s2913_s29, %s3432_s29   ;;  %s2788_s28 = sphi %s2911_s28, %s3436_s28   ;;  %s2784_s27 = sphi %s2909_s27, %s3435_s27  }
  0x11   : > { %3406 = sst [smem:[#allocation15_spill]] %s2792_s29  ;;  %s2321_s20 = sadd.s32 4294967294, %s2804_s19  }
  0x12   : > { %3407 = sst [smem:[#allocation16_spill]] %s2796_s30  ;;  %s49_s21 = sadd.s32 1, %s2800_s0 }
  0x13   : > { %3408 = sst [smem:[#allocation17_spill]] %s2800_s0  ;;  %s58_s22 = sadd.s32 1, %s2792_s29 }
  0x14   : > { %p51_p0 = scmp.ge.s32.totalorder %s49_s21, 2  ;;  %p65_p1 = scmp.ne.s32.totalorder %s2792_s29, %s2788_s28 }
  0x15   : > { %p66_p2 = scmp.eq.s32.totalorder %s2804_s19, 0  ;;  %p71_p3 = scmp.ne.s32.totalorder %s2788_s28, %s2784_s27 }
  0x16   : > { %s3438_s21 = smov (%p51_p0, %s49_s21), 0  ;;  %p72_p5 = scmp.eq.s32.totalorder %s2320_s1, 0 }
  0x17   : > { %3409 = sst [smem:[#allocation18_spill]] %s3438_s21  ;;  %p2950_p4 = por %p66_p2, %p65_p1 }
  0x18   : > { %s53_s23 = ssub.s32 %s2800_s0, %s3438_s21  ;;  %p459_p6 = scmp.eq.s32.totalorder %s2320_s1, 1 }
  0x19   : > { %p56_p7 = scmp.eq.s32.totalorder %s53_s23, 0  ;;  %p2956_p8 = por %p72_p5, %p71_p3 }
  0x1a   : > { %p2960_p9 = por %p459_p6, %p65_p1  ;;  %p465_p10 = scmp.eq.s32.totalorder %s2321_s20, 1 }
  0x1b   : > { %s2965_s26 = scalar_select %p56_p7, %s2792_s29, %s58_s22  }
  0x1c   : > { %s3412_s25 = scalar_select %p2960_p9, 1, 0 }
  0x1d   : > { %3414 = sst [smem:[#allocation20_spill]] %s2965_s26  ;;  %p2967_p11 = por %p465_p10, %p71_p3 }
  0x1e   : > { %3413 = sst [smem:[#allocation19_spill]] %s3412_s25  ;;  %p2585_p13 = scmp.lt.s32.totalorder %s2804_s19, 2 }
  0x1f   : > { %s3415_s27 = scalar_select %p2967_p11, 1, 0 }
  0x20   : > { %s2974_s1 = sand.u32 1, %s2792_s29   ;;  %s2325_s21 = sshll.u32 %s2800_s0, 7 }
  0x21   : > { %3416 = sst [smem:[#allocation21_spill]] %s3415_s27  ;;  %s2324_s23 = sshll.u32 %s2974_s1, 3 }
  0x22   : > { %s3417_s15 = sld [smem:[#allocation22_spill]]  ;;  %s537_s25 = scalar_lea.vmem [#allocation5], %s2324_s23 }
  0x23   : > { %s545_s20 = sshll.u32 %s537_s25, 4  ;;  %p2983_p0 = pnand %p2585_p13, %p2950_p4  ;;  %s546_s20 = int_to_ptr.vmem [resolvable:$true] %s545_s20 }
  0x24   : > { %p2328_p1 = scmp.ge.s32.totalorder %s2804_s19, 1  ;;  %p568_p2 = scmp.lt.s32.totalorder %s2804_s19, 3 }
  0x25   : > { %s534_s26 = scalar_lea.sflag [#allocation6], %s2974_s1  ;;  %p2666_p3 = pneg %p2983_p0 }
  0x26   : > { %s2677_s0 = scalar_lea.vmem %s546_s20, 128 }
  0x27   : > { %p2678_p5 = scmp.ne.s32.totalorder %s546_s20, %s2677_s0 }
  0x28   : > { %s543_s30 = scalar_lea.hbm %s3417_s15, %s2325_s21  ;;  %s2806_s15 = smov [#allocation5]  }
  0x29   : > { %p2680_p6 = pnand %p2678_p5, %p2666_p3  ;;  %s2682_s17 = sshll.u32 %s2806_s15, 4  ;;  %s2683_s17 = int_to_ptr.vmem [resolvable:$false] %s2682_s17 }
  0x2a   : > { %s2684_s18 = scalar_lea.vmem %s2683_s17, 256  ;;  %p2685_p4 = scmp.lt.s32.totalorder %s546_s20, %s2683_s17 }
  0x2b   : > { %p2681_p7 = pneg %p2680_p6  ;;  %p2686_p10 = scmp.lt.s32.totalorder %s2684_s18, %s2677_s0 }
  0x2d   : > { %p2687_p13 = por %p2686_p10, %p2685_p4 }
  0x2f   : > { %p2688_p12 = pnand %p2687_p13, %p2681_p7 }
  0x31   : > { %2691 = shalt.err (!%p2688_p12)
}
  0x32   : > { %2577 = dma.hbm_to_vmem [thread:$0]  (!%p2983_p0), %s543_s30, 128, %s546_s20, %s534_s26  }
  0x33   : > { %p3001_p5 = pnand %p2328_p1, %p568_p2  ;;  %s3420_s17 = sld [smem:[#allocation23_spill]] }
  0x34   : > { %s556_s18 = scalar_lea.vmem [#allocation8], %s2324_s23  ;;  %s553_s27 = scalar_lea.sflag [#allocation9], %s2974_s1 }
  0x35   : > { %s563_s29 = sshll.u32 %s556_s18, 4  ;;  %s2807_s30 = smov [#allocation8]   ;;  %s564_s29 = int_to_ptr.vmem [resolvable:$true] %s563_s29 }
  0x36   : > { %s2705_s13 = scalar_lea.vmem %s564_s29, 128  ;;  %s2710_s26 = sshll.u32 %s2807_s30, 4  ;;  %s2711_s26 = int_to_ptr.vmem [resolvable:$false] %s2710_s26 }
  0x37   : > { %p2706_p12 = scmp.ne.s32.totalorder %s564_s29, %s2705_s13  ;;  %s2712_s20 = scalar_lea.vmem %s2711_s26, 256 }
  0x38   : > { %p2713_p1 = scmp.lt.s32.totalorder %s564_s29, %s2711_s26  ;;  %p2714_p2 = scmp.lt.s32.totalorder %s2712_s20, %s2705_s13 }
  0x39   : > { %s561_s0 = scalar_lea.hbm %s3420_s17, %s2325_s21  ;;  %p2708_p6 = pnand %p2706_p12, %p2666_p3 }
  0x3a   : > { %p2715_p4 = por %p2714_p2, %p2713_p1 }
  0x3b   : > { %p2709_p7 = pneg %p2708_p6 }
  0x3d   : > { %p2716_p10 = pnand %p2715_p4, %p2709_p7 }
  0x3f   : > { %2719 = shalt.err (!%p2716_p10)
}
  0x40   : > { %2580 = dma.hbm_to_vmem [thread:$0]  (!%p2983_p0), %s561_s0, 128, %s564_s29, %s553_s27  }
  0x41   : > { %572 = sbr.rel (%p3001_p5) target bundleno = 2122 (0x84a), region = 92  ;;  %s3017_s21 = sand.u32 (!%p3001_p5), 1, %s2788_s28  }
  0x42   : > { %s3020_s1 = sshll.u32 (!%p3001_p5), %s3017_s21, 3  ;;  %s575_s23 = scalar_lea.sflag (!%p3001_p5), [#allocation6], %s3017_s21 }
  0x43   : > { %s578_s13 = scalar_lea.vmem (!%p3001_p5), [#allocation5], %s3020_s1 }
  0x46   : > { %2771 = dma.done.wait (%p2956_p8), %s575_s23, 128  }
  0x47   : > { %2773 = vsyncadd (%p2956_p8), %s575_s23, 4294967168  ;;  %s584_s27 = scalar_lea.sflag [#allocation9], %s3017_s21  ;;  %s587_s29 = scalar_lea.vmem [#allocation8], %s3020_s1 }
  0x48   : > { %2775 = dma.done.wait (%p2956_p8), %s584_s27, 128  }
  0x49   : > { %2777 = vsyncadd (%p2956_p8), %s584_s27, 4294967168  ;;  %vm652_vm0 = vcmask 261120   ;;  %v3034_v0 = vld [vmem:[%s578_s13] sm:$0xff]  ;;  %v649_v1 = vld [vmem:[%s587_s29] sm:$0xff]  ;;  %v2808_v9 = vmov 0.0   ;;  %vm2809_vm1 = vmmov 0  }
  0x4a   : > { %v887_v2 = vsel %vm652_vm0, %v3034_v0, 0.0  ;;  %v653_v3 = vsel %vm652_vm0, %v649_v1, 0.0  ;;  %v892_v4 = vmul.f32 %v3034_v0, %v3034_v0  ;;  %v658_v5 = vmul.f32 %v649_v1, %v649_v1  ;;  %v686_v8 = vld [vmem:[%s3377_s6 + $0x18] sm:$0xff]  ;;  %2429 = vmatprep.subr.mxu0 %v2808_v9  ;;  %v685_v10 = vld [vmem:[%s3377_s6 + $0x10] sm:$0xff]  ;;  %2437 = vmatprep.mubr.msk.f32.mxu0 %vm2809_vm1, %v2808_v9  ;;  %v684_v11 = vld [vmem:[%s3377_s6 + $0x8] sm:$0xff]  ;;  %s3421_s20 = sld [smem:[#allocation24_spill]] }
  0x4b   : > { %888 = vadd.xlane.f32.xlu1 %v887_v2  ;;  %654 = vadd.xlane.f32.xlu0 %v653_v3  ;;  %v683_v12 = vld [vmem:[%s3377_s6] sm:$0xff]  ;;  %v770_v34 = vld [vmem:[%s3379_s8 + $0x18] sm:$0xff]  ;;  %v769_v35 = vld [vmem:[%s3379_s8 + $0x10] sm:$0xff]  ;;  %vm848_vm2 = vcmask 64512   ;;  %s2810_s22 = smov 112   ;;  %s2811_s2 = smov 120  }
  0x4c   : > { %v893_v6 = vsel %vm652_vm0, %v892_v4, 0.0  ;;  %v659_v7 = vsel %vm652_vm0, %v658_v5, 0.0  ;;  %2430 = vmatpush3.msra.mxu0 %v686_v8  ;;  %2467 = vmatprep.subr.mxu1 %v2808_v9  ;;  %v2333_v31 = vld [vmem:[%s3374_s3] ss:$0 sm:$0xff]  ;;  %v768_v36 = vld [vmem:[%s3379_s8 + $0x8] sm:$0xff]  ;;  %v920_v40 = vld [vmem:[%s3375_s4 + $0x18] sm:$0xff] }
  0x4d   : > { %2431 = vmatprep.subr.mxu0 %v2808_v9  ;;  %2469 = vmatprep.mubr.msk.f32.mxu1 %vm2809_vm1, %v2808_v9  ;;  %v767_v39 = vld [vmem:[%s3379_s8] sm:$0xff]  ;;  %v919_v42 = vld [vmem:[%s3375_s4 + $0x10] sm:$0xff]  ;;  %v918_v43 = vld [vmem:[%s3375_s4 + $0x8] sm:$0xff]  ;;  %s2812_s17 = smov 104   ;;  %s3422_s30 = sld [smem:[#allocation25_spill]] }
  0x4e   : > { %2432 = vmatpush3.msra.mxu0 %v685_v10  ;;  %v917_v45 = vld [vmem:[%s3375_s4] sm:$0xff]  ;;  %s3423_s25 = sld [smem:[#allocation16_spill]]  ;;  %s644_s13 = scalar_lea.vmem [#allocation10], %s3020_s1 }
  0x4f   : > { %894 = vadd.xlane.f32.xlu1 %v893_v6  ;;  %660 = vadd.xlane.f32.xlu0 %v659_v7  ;;  %v2334_v47 = vld [vmem:[%s3378_s7] ss:$0 sm:$0xff]  ;;  %s3424_s0 = sld [smem:[#allocation26_spill]]  ;;  %s2217_s27 = sshll.u32 %s644_s13, 4  ;;  %s2218_s27 = int_to_ptr.vmem [resolvable:$true] %s2217_s27 }
  0x50   : > { %2433 = vmatprep.subr.mxu0 %v2808_v9  ;;  %v2332_v29 = vld [vmem:[%s3421_s20] ss:$0 sm:$0xff]  ;;  %s3426_s20 = sld [smem:[#allocation27_spill]]  ;;  %s2203_s15 = scalar_lea.sflag [#allocation7], %s3017_s21 }
  0x51   : > { %2434 = vmatpush3.msra.mxu0 %v684_v11  ;;  %v2336_v51 = vld [vmem:[%s3380_s9] ss:$0 sm:$0xff] }
  0x52   : > { %2435 = vmatprep.subr.mxu0 %v2808_v9  ;;  %v2340_v56 = vld [vmem:[%s3376_s5] ss:$0 sm:$0xff] }
  0x53   : > { %2436 = vmatpush3.msra.mxu0 %v683_v12 }
  0x54   : > { %2440 = vmatprep.subr.mxu0 %v2808_v9  ;;  %s2365_s23 = sshll.u32 %s3423_s25, 7  ;;  %s2813_s25 = smov [#allocation10]  }
  0x55   : > { %s2724_s1 = sshll.u32 %s2813_s25, 4  ;;  %s2725_s1 = int_to_ptr.vmem [resolvable:$false] %s2724_s1 }
  0x56   : > { %p2727_p13 = scmp.lt.s32.totalorder %s2218_s27, %s2725_s1 }
  0xd4   : > { %v655_v13 = vpop.xlane.xlu0 %654  ;;  %v889_v14 = vpop.xlane.xlu1 %888 }
  0xd5   : > { %v657_v15 = vmul.f32 0.03125, %v655_v13  ;;  %v891_v19 = vmul.f32 0.03125, %v889_v14 }
  0xd7   : > { %v663_v17 = vmul.f32 %v657_v15, %v657_v15  ;;  %v897_v23 = vmul.f32 %v891_v19, %v891_v19  ;;  %v665_v27 = vsub.f32 %v649_v1, %v657_v15  ;;  %v899_v38 = vsub.f32 %v3034_v0, %v891_v19 }
  0xd8   : > { %v661_v16 = vpop.xlane.xlu0 %660  ;;  %v895_v20 = vpop.xlane.xlu1 %894 }
  0xd9   : > { %v662_v18 = vmul.f32 0.03125, %v661_v16  ;;  %v896_v24 = vmul.f32 0.03125, %v895_v20 }
  0xdb   : > { %v664_v21 = vsub.f32 %v662_v18, %v663_v17  ;;  %v898_v25 = vsub.f32 %v896_v24, %v897_v23 }
  0xdd   : > { %v666_v22 = vadd.f32 1e-05, %v664_v21  ;;  %v900_v26 = vadd.f32 1e-05, %v898_v25 }
  0xdf   : > { %2640 = vrsqrt.f32 %v666_v22 }
  0xe0   : > { %2642 = vrsqrt.f32 %v900_v26 }
  0xec   : > { %v2641_v28 = vpop.eup %2640 }
  0xed   : > { %v668_v30 = vmul.f32 %v2641_v28, %v665_v27  ;;  %v2643_v37 = vpop.eup %2642 }
  0xee   : > { %v902_v41 = vmul.f32 %v2643_v37, %v899_v38 }
  0xef   : > { %v675_v32 = vmul.f32 %v2332_v29, %v668_v30 }
  0xf0   : > { %v909_v44 = vmul.f32 %v2332_v29, %v902_v41 }
  0xf1   : > { %v682_v33 = vadd.f32 %v2333_v31, %v675_v32 }
  0xf2   : > { %v916_v46 = vadd.f32 %v2333_v31, %v909_v44 }
  0xf3   : > { %2438 = vmatmul.mubr.msk.f32.vlgmr.msra.gmra.mxu0 %vm652_vm0, %v682_v33 }
  0xf4   : > { %2441 = vmatpush3.msra.mxu0 %v770_v34  ;;  %2448 = vmatprep.mubr.msk.f32.mxu0 %vm2809_vm1, %v2808_v9 }
  0xf5   : > { %2442 = vmatprep.subr.mxu0 %v2808_v9 }
  0xf6   : > { %2443 = vmatpush3.msra.mxu0 %v769_v35 }
  0xf7   : > { %2444 = vmatprep.subr.mxu0 %v2808_v9 }
  0xf8   : > { %2445 = vmatpush3.msra.mxu0 %v768_v36 }
  0xf9   : > { %2446 = vmatprep.subr.mxu0 %v2808_v9 }
  0xfa   : > { %2447 = vmatpush3.msra.mxu0 %v767_v39 }
  0xfb   : > { %2449 = vmatmul.mubr.msk.f32.vlgmr.msra.gmra.mxu0 %vm652_vm0, %v682_v33  ;;  %2451 = vmatprep.subr.mxu0 %v2808_v9 }
  0xfc   : > { %2452 = vmatpush3.msra.mxu0 %v920_v40  ;;  %2459 = vmatprep.mubr.msk.f32.mxu0 %vm2809_vm1, %v2808_v9 }
  0xfd   : > { %2453 = vmatprep.subr.mxu0 %v2808_v9 }
  0xfe   : > { %2454 = vmatpush3.msra.mxu0 %v919_v42 }
  0xff   : > { %2455 = vmatprep.subr.mxu0 %v2808_v9 }
 0x100   : > { %2456 = vmatpush3.msra.mxu0 %v918_v43 }
 0x101   : > { %2457 = vmatprep.subr.mxu0 %v2808_v9 }
 0x102   : > { %2458 = vmatpush3.msra.mxu0 %v917_v45 }
 0x103   : > { %2460 = vmatmul.mubr.msk.f32.vlgmr.msra.gmra.mxu0 %vm652_vm0, %v916_v46  ;;  %2462 = vmatprep.subr.mxu0 %v2808_v9 }
 0x104   : > { %2464 = vmatprep.mubr.msk.f32.mxu0 %vm2809_vm1, %v2808_v9 }
 0x1b3   : > { %v763_v48 = vpop.f32.mrf.mxu0 }
 0x1b4   : > { %v764_v49 = vadd.f32 %v2334_v47, %v763_v48 }
 0x1b5   : > { %v2439_v50 = vpop.f32.mrf.mxu0 }
 0x1b6   : > { %849 = vst.msk [vmem:[#allocation2] sm:$0xff] %vm848_vm2, %v764_v49  ;;  %863 = vrot.lane.b32.xlu1 %v764_v49, %s2810_s22  ;;  %852 = vrot.lane.b32.xlu0 %v764_v49, %s2811_s2 }
 0x1ba   : > { %873 = vrot.lane.b32.xlu1 %v764_v49, %s2812_s17 }
 0x1bb   : > { %v844_v52 = vpop.f32.mrf.mxu0 }
 0x1bc   : > { %v3123_v53 = vadd.f32 %v2336_v51, %v844_v52 }
 0x1bd   : > { %v2450_v54 = vpop.f32.mrf.mxu0  ;;  %v1023_v55 = vld [vmem:[#allocation2] sm:$0xff] }
 0x1be   : > { %850 = vst.msk [vmem:[#allocation3] sm:$0xff] %vm848_vm2, %v3123_v53  ;;  %2463 = vmatpush3.xpose.msk.msra.mxu0 %vm848_vm2, %v1023_v55 }
 0x1bf   : > { %2472 = vmatprep.subr.mxu0 %v2808_v9 }
 0x1c3   : > { %v997_v57 = vpop.f32.mrf.mxu0 }
 0x1c4   : > { %v998_v58 = vadd.f32 %v2340_v56, %v997_v57 }
 0x1c5   : > { %v2461_v59 = vpop.f32.mrf.mxu0  ;;  %v1027_v10 = vld [vmem:[#allocation3] sm:$0xff] }
 0x1c6   : > { %1002 = vst.msk [vmem:[#allocation4] sm:$0xff] %vm848_vm2, %v998_v58  ;;  %1009 = vrot.lane.b32.xlu0 %v998_v58, %s2810_s22  ;;  %1004 = vrot.lane.b32.xlu1 %v998_v58, %s2811_s2 }
 0x1ca   : > { %1014 = vrot.lane.b32.xlu1 %v998_v58, %s2812_s17 }
 0x1cd   : > { %v1019_v60 = vld [vmem:[#allocation4] sm:$0xff] }
 0x1ce   : > { %2465 = vmatmul.mubr.msk.f32.vlgmr.msra.gmra.mxu0 %vm848_vm2, %v1019_v60 }
 0x1cf   : > { %2474 = vmatprep.mubr.msk.f32.mxu0 %vm2809_vm1, %v2808_v9 }
 0x228   : > { %v864_v61 = vpop.permute.xlu1 %863  ;;  %v853_v62 = vpop.permute.xlu0 %852 }
 0x229   : > { %867 = vst.msk [vmem:[#allocation2 + $0x10] sm:$0xff] %vm848_vm2, %v864_v61  ;;  %856 = vst.msk [vmem:[#allocation2 + $0x8] sm:$0xff] %vm848_vm2, %v853_v62  ;;  %v1675_v61 = vld [vmem:[%s3381_s10] sm:$0xff] }
 0x22c   : > { %v874_v63 = vpop.permute.xlu1 %873 }
 0x22d   : > { %877 = vst.msk [vmem:[#allocation2 + $0x18] sm:$0xff] %vm848_vm2, %v874_v63 }
 0x230   : > { %v1024_v1 = vld [vmem:[#allocation2 + $0x8] sm:$0xff]  ;;  %v1025_v2 = vld [vmem:[#allocation2 + $0x10] sm:$0xff] }
 0x231   : > { %2468 = vmatpush3.xpose.msk.msra.mxu1 %vm848_vm2, %v1024_v1  ;;  %2473 = vmatpush3.xpose.msk.msra.mxu0 %vm848_vm2, %v1025_v2 }
 0x232   : > { %2477 = vmatprep.subr.mxu1 %v2808_v9  ;;  %2482 = vmatprep.subr.mxu0 %v2808_v9 }
 0x234   : > { %v1026_v8 = vld [vmem:[#allocation2 + $0x18] sm:$0xff] }
 0x238   : > { %v1010_v3 = vpop.permute.xlu0 %1009  ;;  %v1005_v4 = vpop.permute.xlu1 %1004 }
 0x239   : > { %1013 = vst.msk [vmem:[#allocation4 + $0x10] sm:$0xff] %vm848_vm2, %v1010_v3  ;;  %1008 = vst.msk [vmem:[#allocation4 + $0x8] sm:$0xff] %vm848_vm2, %v1005_v4  ;;  %v1676_v4 = vld [vmem:[%s3381_s10 + $0x8] sm:$0xff] }
 0x23c   : > { %v1015_v5 = vpop.permute.xlu1 %1014 }
 0x23d   : > { %1018 = vst.msk [vmem:[#allocation4 + $0x18] sm:$0xff] %vm848_vm2, %v1015_v5  ;;  %v1677_v5 = vld [vmem:[%s3381_s10 + $0x10] sm:$0xff] }
 0x240   : > { %v1020_v6 = vld [vmem:[#allocation4 + $0x8] sm:$0xff]  ;;  %v1021_v7 = vld [vmem:[#allocation4 + $0x10] sm:$0xff] }
 0x241   : > { %2470 = vmatmul.mubr.msk.f32.vlgmr.msra.gmra.mxu1 %vm848_vm2, %v1020_v6  ;;  %2475 = vmatmul.mubr.msk.f32.vlgmr.msra.gmra.mxu0 %vm848_vm2, %v1021_v7 }
 0x242   : > { %2478 = vmatpush3.xpose.msk.msra.mxu1 %vm848_vm2, %v1026_v8  ;;  %2483 = vmatpush3.msra.mxu0 %v1027_v10  ;;  %v1678_v8 = vld [vmem:[%s3381_s10 + $0x18] sm:$0xff] }
 0x243   : > { %2479 = vmatprep.mubr.msk.f32.mxu1 %vm2809_vm1, %v2808_v9  ;;  %2484 = vmatprep.mubr.msk.f32.mxu0 %vm2809_vm1, %v2808_v9 }
 0x244   : > { %v1022_v11 = vld [vmem:[#allocation4 + $0x18] sm:$0xff]  ;;  %2487 = vmatprep.subr.mxu1 %v2808_v9  ;;  %2492 = vmatprep.subr.mxu0 %v2808_v9 }
 0x245   : > { %2480 = vmatmul.mubr.msk.f32.vlgmr.msra.gmra.mxu1 %vm848_vm2, %v1022_v11 }
 0x246   : > { %2489 = vmatprep.mubr.msk.f32.mxu1 %vm2809_vm1, %v2808_v9 }
 0x28e   : > { %v1103_v12 = vpop.f32.mrf.mxu0 }
 0x28f   : > { %v1335_v13 = vmul.f32 0.35355338, %v1103_v12 }
 0x290   : > { %v2466_v14 = vpop.f32.mrf.mxu0 }
 0x291   : > { %v1339_v15 = vsel %vm848_vm2, %v1335_v13, -inf }
 0x292   : > { %1340 = vmax.xlane.f32.xlu0 %v1339_v15 }
 0x301   : > { %v1179_v16 = vpop.f32.mrf.mxu1  ;;  %v1255_v17 = vpop.f32.mrf.mxu0 }
 0x302   : > { %v1336_v18 = vmul.f32 0.35355338, %v1179_v16  ;;  %v1337_v19 = vmul.f32 0.35355338, %v1255_v17 }
 0x303   : > { %v2471_v20 = vpop.f32.mrf.mxu1  ;;  %v2476_v21 = vpop.f32.mrf.mxu0 }
 0x304   : > { %v1342_v22 = vsel %vm848_vm2, %v1336_v18, -inf  ;;  %v1345_v23 = vsel %vm848_vm2, %v1337_v19, -inf }
 0x305   : > { %1343 = vmax.xlane.f32.xlu1 %v1342_v22  ;;  %v1331_v24 = vpop.f32.mrf.mxu1  ;;  %1346 = vmax.xlane.f32.xlu0 %v1345_v23 }
 0x306   : > { %v1338_v25 = vmul.f32 0.35355338, %v1331_v24 }
 0x307   : > { %v2481_v26 = vpop.f32.mrf.mxu1 }
 0x308   : > { %v1348_v27 = vsel %vm848_vm2, %v1338_v25, -inf }
 0x309   : > { %1349 = vmax.xlane.f32.xlu0 %v1348_v27 }
 0x31b   : > { %v1341_v28 = vpop.xlane.xlu0 %1340 }
 0x31c   : > { %v1351_v29 = vsub.f32 %v1335_v13, %v1341_v28 }
 0x31e   : > { %v1355_v30 = vmul.f32 1.442695, %v1351_v29  ;;  %v2358_v29 = vld [vmem:[%s3382_s11] ss:$0 sm:$0xff] }
 0x320   : > { %2644 = vpow2.f32 %v1355_v30 }
 0x32d   : > { %v2645_v31 = vpop.eup %2644 }
 0x32e   : > { %v1363_v32 = vsel %vm848_vm2, %v2645_v31, 0.0 }
 0x32f   : > { %1364 = vadd.xlane.f32.xlu0 %v1363_v32 }
 0x38e   : > { %v1344_v33 = vpop.xlane.xlu1 %1343  ;;  %v1347_v34 = vpop.xlane.xlu0 %1346 }
 0x38f   : > { %v1352_v35 = vsub.f32 %v1336_v18, %v1344_v33  ;;  %v1353_v36 = vsub.f32 %v1337_v19, %v1347_v34 }
 0x391   : > { %v1357_v37 = vmul.f32 1.442695, %v1352_v35  ;;  %v1359_v38 = vmul.f32 1.442695, %v1353_v36 }
 0x392   : > { %v1350_v43 = vpop.xlane.xlu0 %1349 }
 0x393   : > { %2646 = vpow2.f32 %v1357_v37  ;;  %v1354_v45 = vsub.f32 %v1338_v25, %v1350_v43  ;;  %v2021_v37 = vld [vmem:[%s3385_s14 + $0x18] sm:$0xff]  ;;  %v2119_v43 = vld [vmem:[%s3387_s16 + $0x60] sm:$0xff] }
 0x394   : > { %2648 = vpow2.f32 %v1359_v38  ;;  %v2020_v38 = vld [vmem:[%s3385_s14 + $0x10] sm:$0xff] }
 0x395   : > { %v1361_v46 = vmul.f32 1.442695, %v1354_v45 }
 0x3a0   : > { %v2647_v39 = vpop.eup %2646 }
 0x3a1   : > { %v2649_v40 = vpop.eup %2648  ;;  %v1366_v41 = vsel %vm848_vm2, %v2647_v39, 0.0 }
 0x3a2   : > { %1367 = vadd.xlane.f32.xlu1 %v1366_v41  ;;  %v1369_v42 = vsel %vm848_vm2, %v2649_v40, 0.0  ;;  %v2121_v41 = vld [vmem:[%s3387_s16 + $0x70] sm:$0xff] }
 0x3a3   : > { %1370 = vadd.xlane.f32.xlu0 %v1369_v42  ;;  %v2120_v42 = vld [vmem:[%s3387_s16 + $0x68] sm:$0xff] }
 0x3b3   : > { %868 = vrot.lane.b32.xlu1 %v3123_v53, %s2810_s22  ;;  %s3427_s22 = sld [smem:[#allocation28_spill]] }
 0x3b8   : > { %v1365_v44 = vpop.xlane.xlu0 %1364 }
 0x3b9   : > { %858 = vrot.lane.b32.xlu0 %v3123_v53, %s2811_s2  ;;  %2650 = vrcp.f32 %v1365_v44  ;;  %s2215_s2 = scalar_lea.hbm %s3427_s22, %s2365_s23 }
 0x3ba   : > { %2652 = vpow2.f32 %v1361_v46 }
 0x3c6   : > { %v2651_v47 = vpop.eup %2650 }
 0x3c7   : > { %v1379_v48 = vmul.f32 %v2651_v47, %v2645_v31  ;;  %v2653_v49 = vpop.eup %2652 }
 0x3c8   : > { %v1372_v50 = vsel %vm848_vm2, %v2653_v49, 0.0 }
 0x3c9   : > { %2485 = vmatmul.mubr.msk.f32.vlgmr.msra.gmra.mxu0 %vm848_vm2, %v1379_v48 }
 0x3ca   : > { %2494 = vmatprep.mubr.msk.f32.mxu0 %vm2809_vm1, %v2808_v9 }
 0x3d7   : > { %1373 = vadd.xlane.f32.xlu1 %v1372_v50 }
 0x3e8   : > { %878 = vrot.lane.b32.xlu1 %v3123_v53, %s2812_s17  ;;  %s2720_s17 = scalar_lea.vmem %s2218_s27, 128 }
 0x3e9   : > { %p2721_p8 = scmp.ne.s32.totalorder %s2218_s27, %s2720_s17 }
 0x3eb   : > { %p2722_p0 = pnand %p2721_p8, %p2960_p9 }
 0x3ed   : > { %p2723_p3 = pneg %p2722_p0 }
 0x42b   : > { %v1368_v51 = vpop.xlane.xlu1 %1367 }
 0x42c   : > { %2654 = vrcp.f32 %v1368_v51  ;;  %v1371_v52 = vpop.xlane.xlu0 %1370 }
 0x42d   : > { %2656 = vrcp.f32 %v1371_v52 }
 0x42f   : > { %v869_v54 = vpop.permute.xlu1 %868 }
 0x430   : > { %872 = vst.msk [vmem:[#allocation3 + $0x10] sm:$0xff] %vm848_vm2, %v869_v54  ;;  %v859_v55 = vpop.permute.xlu0 %858  ;;  %v2359_v54 = vld [vmem:[%s3383_s12] ss:$0 sm:$0xff] }
 0x431   : > { %862 = vst.msk [vmem:[#allocation3 + $0x8] sm:$0xff] %vm848_vm2, %v859_v55 }
 0x437   : > { %v1029_v56 = vld [vmem:[#allocation3 + $0x10] sm:$0xff] }
 0x438   : > { %v1028_v57 = vld [vmem:[#allocation3 + $0x8] sm:$0xff]  ;;  %2493 = vmatpush3.msra.mxu0 %v1029_v56  ;;  %v2360_v56 = vld [vmem:[%s3422_s30] ss:$0 sm:$0xff] }
 0x439   : > { %v2655_v58 = vpop.eup %2654  ;;  %2488 = vmatpush3.msra.mxu1 %v1028_v57  ;;  %2502 = vmatprep.subr.mxu0 %v2808_v9 }
 0x43a   : > { %v2657_v59 = vpop.eup %2656  ;;  %v1380_v60 = vmul.f32 %v2655_v58, %v2647_v39  ;;  %2497 = vmatprep.subr.mxu1 %v2808_v9  ;;  %v2018_v39 = vld [vmem:[%s3385_s14] sm:$0xff] }
 0x43b   : > { %v1381_v53 = vmul.f32 %v2657_v59, %v2649_v40  ;;  %v2122_v40 = vld [vmem:[%s3387_s16 + $0x78] sm:$0xff] }
 0x43c   : > { %2490 = vmatmul.mubr.msk.f32.vlgmr.msra.gmra.mxu1 %vm848_vm2, %v1380_v60  ;;  %v2118_v59 = vld [vmem:[%s3387_s16 + $0x58] sm:$0xff]  ;;  %v2117_v60 = vld [vmem:[%s3387_s16 + $0x50] sm:$0xff] }
 0x43d   : > { %2495 = vmatmul.mubr.msk.f32.vlgmr.msra.gmra.mxu0 %vm848_vm2, %v1381_v53  ;;  %2499 = vmatprep.mubr.msk.f32.mxu1 %vm2809_vm1, %v2808_v9  ;;  %v2116_v53 = vld [vmem:[%s3387_s16 + $0x48] sm:$0xff] }
 0x43e   : > { %2503 = vmatpush3.msra.mxu0 %v1675_v61  ;;  %2504 = vmatprep.mubr.msk.f32.mxu0 %vm2809_vm1, %v2808_v9  ;;  %v2115_v61 = vld [vmem:[%s3387_s16 + $0x40] sm:$0xff] }
 0x43f   : > { %2512 = vmatprep.subr.mxu0 %v2808_v9 }
 0x460   : > { %v1374_v62 = vpop.xlane.xlu1 %1373 }
 0x461   : > { %2658 = vrcp.f32 %v1374_v62  ;;  %v2114_v62 = vld [vmem:[%s3387_s16 + $0x38] sm:$0xff] }
 0x464   : > { %v879_v63 = vpop.permute.xlu1 %878 }
 0x465   : > { %882 = vst.msk [vmem:[#allocation3 + $0x18] sm:$0xff] %vm848_vm2, %v879_v63  ;;  %v2113_v63 = vld [vmem:[%s3387_s16 + $0x30] sm:$0xff] }
 0x46c   : > { %v1030_v1 = vld [vmem:[#allocation3 + $0x18] sm:$0xff] }
 0x46d   : > { %2498 = vmatpush3.msra.mxu1 %v1030_v1  ;;  %v2112_v1 = vld [vmem:[%s3387_s16 + $0x28] sm:$0xff] }
 0x46e   : > { %v2659_v2 = vpop.eup %2658  ;;  %2507 = vmatprep.subr.mxu1 %v2808_v9 }
 0x46f   : > { %v1382_v3 = vmul.f32 %v2659_v2, %v2653_v49  ;;  %v2111_v2 = vld [vmem:[%s3387_s16 + $0x20] sm:$0xff] }
 0x471   : > { %2500 = vmatmul.mubr.msk.f32.vlgmr.msra.gmra.mxu1 %vm848_vm2, %v1382_v3  ;;  %v2110_v3 = vld [vmem:[%s3387_s16 + $0x18] sm:$0xff] }
 0x472   : > { %2509 = vmatprep.mubr.msk.f32.mxu1 %vm2809_vm1, %v2808_v9  ;;  %2508 = vmatpush3.msra.mxu1 %v1676_v4  ;;  %v2109_v4 = vld [vmem:[%s3387_s16 + $0x10] sm:$0xff] }
 0x473   : > { %2517 = vmatprep.subr.mxu1 %v2808_v9 }
 0x489   : > { %v1452_v6 = vpop.f32.mrf.mxu0 }
 0x48a   : > { %2505 = vmatmul.mubr.msk.f32.vlgmr.msra.gmra.mxu0 %vm848_vm2, %v1452_v6  ;;  %v2107_v6 = vld [vmem:[%s3387_s16] sm:$0xff] }
 0x48b   : > { %v2486_v7 = vpop.f32.mrf.mxu0  ;;  %2513 = vmatpush3.msra.mxu0 %v1677_v5  ;;  %2514 = vmatprep.mubr.msk.f32.mxu0 %vm2809_vm1, %v2808_v9  ;;  %v2108_v5 = vld [vmem:[%s3387_s16 + $0x8] sm:$0xff] }
 0x48c   : > { %2522 = vmatprep.subr.mxu0 %v2808_v9  ;;  %v2361_v7 = vld [vmem:[%s3424_s0] ss:$0 sm:$0xff]  ;;  %s2726_s0 = scalar_lea.vmem %s2725_s1, 256 }
 0x48d   : > { %p2728_p5 = scmp.lt.s32.totalorder %s2726_s0, %s2720_s17 }
 0x48f   : > { %p2729_p12 = por %p2728_p5, %p2727_p13 }
 0x491   : > { %p2730_p6 = pnand %p2729_p12, %p2723_p3 }
 0x4fc   : > { %v1525_v10 = vpop.f32.mrf.mxu1 }
 0x4fd   : > { %v1598_v11 = vpop.f32.mrf.mxu0  ;;  %2510 = vmatmul.mubr.msk.f32.vlgmr.msra.gmra.mxu1 %vm848_vm2, %v1525_v10 }
 0x4fe   : > { %2515 = vmatmul.mubr.msk.f32.vlgmr.msra.gmra.mxu0 %vm848_vm2, %v1598_v11  ;;  %v2491_v12 = vpop.f32.mrf.mxu1  ;;  %2518 = vmatpush3.msra.mxu1 %v1678_v8 }
 0x4ff   : > { %v2496_v13 = vpop.f32.mrf.mxu0  ;;  %2519 = vmatprep.mubr.msk.f32.mxu1 %vm2809_vm1, %v2808_v9  ;;  %2530 = vmatprep.mubr.msk.f32.mxu0 %vm2809_vm1, %v2808_v9 }
 0x500   : > { %2533 = vmatprep.subr.mxu1 %v2808_v9  ;;  %2523 = vmatpush3.msra.mxu0 %v2021_v37 }
 0x501   : > { %2524 = vmatprep.subr.mxu0 %v2808_v9 }
 0x502   : > { %2525 = vmatpush3.msra.mxu0 %v2020_v38 }
 0x503   : > { %2526 = vmatprep.subr.mxu0 %v2808_v9 }
 0x531   : > { %v1671_v14 = vpop.f32.mrf.mxu1 }
 0x532   : > { %2520 = vmatmul.mubr.msk.f32.vlgmr.msra.gmra.mxu1 %vm848_vm2, %v1671_v14 }
 0x533   : > { %v2501_v15 = vpop.f32.mrf.mxu1  ;;  %2565 = vmatprep.mubr.msk.f32.mxu1 %vm2809_vm1, %v2808_v9  ;;  %2534 = vmatpush3.msra.mxu1 %v2122_v40 }
 0x534   : > { %2535 = vmatprep.subr.mxu1 %v2808_v9 }
 0x535   : > { %2536 = vmatpush3.msra.mxu1 %v2121_v41 }
 0x536   : > { %2537 = vmatprep.subr.mxu1 %v2808_v9 }
 0x537   : > { %2538 = vmatpush3.msra.mxu1 %v2120_v42 }
 0x538   : > { %2539 = vmatprep.subr.mxu1 %v2808_v9 }
 0x539   : > { %2540 = vmatpush3.msra.mxu1 %v2119_v43 }
 0x53a   : > { %2541 = vmatprep.subr.mxu1 %v2808_v9 }
 0x53b   : > { %2542 = vmatpush3.msra.mxu1 %v2118_v59 }
 0x53c   : > { %2543 = vmatprep.subr.mxu1 %v2808_v9 }
 0x53d   : > { %2544 = vmatpush3.msra.mxu1 %v2117_v60 }
 0x53e   : > { %2545 = vmatprep.subr.mxu1 %v2808_v9 }
 0x53f   : > { %2546 = vmatpush3.msra.mxu1 %v2116_v53 }
 0x540   : > { %2547 = vmatprep.subr.mxu1 %v2808_v9 }
 0x541   : > { %2548 = vmatpush3.msra.mxu1 %v2115_v61 }
 0x542   : > { %2549 = vmatprep.subr.mxu1 %v2808_v9 }
 0x543   : > { %2550 = vmatpush3.msra.mxu1 %v2114_v62 }
 0x544   : > { %2551 = vmatprep.subr.mxu1 %v2808_v9 }
 0x545   : > { %2552 = vmatpush3.msra.mxu1 %v2113_v63 }
 0x546   : > { %2553 = vmatprep.subr.mxu1 %v2808_v9 }
 0x547   : > { %2554 = vmatpush3.msra.mxu1 %v2112_v1 }
 0x548   : > { %2555 = vmatprep.subr.mxu1 %v2808_v9 }
 0x549   : > { %2556 = vmatpush3.msra.mxu1 %v2111_v2 }
 0x54a   : > { %v1748_v16 = vpop.f32.mrf.mxu0  ;;  %2557 = vmatprep.subr.mxu1 %v2808_v9 }
 0x54b   : > { %v1971_v23 = vsel %vm652_vm0, %v1748_v16, 0.0  ;;  %2558 = vmatpush3.msra.mxu1 %v2110_v3 }
 0x54c   : > { %v2506_v17 = vpop.f32.mrf.mxu0  ;;  %2559 = vmatprep.subr.mxu1 %v2808_v9 }
 0x54d   : > { %2560 = vmatpush3.msra.mxu1 %v2109_v4 }
 0x54e   : > { %2561 = vmatprep.subr.mxu1 %v2808_v9 }
 0x54f   : > { %2562 = vmatpush3.msra.mxu1 %v2108_v5 }
 0x550   : > { %2563 = vmatprep.subr.mxu1 %v2808_v9 }
 0x551   : > { %2564 = vmatpush3.msra.mxu1 %v2107_v6 }
 0x5bd   : > { %v1821_v18 = vpop.f32.mrf.mxu1 }
 0x5be   : > { %v1894_v19 = vpop.f32.mrf.mxu0  ;;  %v1972_v22 = vsel %vm652_vm0, %v1821_v18, 0.0 }
 0x5bf   : > { %v2511_v20 = vpop.f32.mrf.mxu1  ;;  %v1973_v24 = vadd.f32 %v1972_v22, %v1971_v23  ;;  %v1974_v25 = vsel %vm652_vm0, %v1894_v19, 0.0 }
 0x5c0   : > { %v2516_v21 = vpop.f32.mrf.mxu0 }
 0x5c1   : > { %v1975_v26 = vadd.f32 %v1974_v25, %v1973_v24 }
 0x5f2   : > { %v1967_v27 = vpop.f32.mrf.mxu1 }
 0x5f3   : > { %v1976_v28 = vsel %vm652_vm0, %v1967_v27, 0.0 }
 0x5f4   : > { %v1977_v30 = vadd.f32 %v1976_v28, %v1975_v26  ;;  %v2521_v31 = vpop.f32.mrf.mxu1 }
 0x5f6   : > { %v1985_v32 = vadd.f32 %v2358_v29, %v1977_v30 }
 0x5f8   : > { %v3229_v33 = vadd.f32 %v1985_v32, %v3034_v0  ;;  %v2019_v0 = vld [vmem:[%s3385_s14 + $0x8] sm:$0xff] }
 0x5f9   : > { %2527 = vmatpush3.msra.mxu0 %v2019_v0 }
 0x5fa   : > { %v1989_v34 = vsel %vm652_vm0, %v3229_v33, 0.0  ;;  %v1993_v35 = vmul.f32 %v3229_v33, %v3229_v33  ;;  %2528 = vmatprep.subr.mxu0 %v2808_v9  ;;  %v2363_v9 = vld [vmem:[%s3426_s20] ss:$0 sm:$0xff] }
 0x5fb   : > { %1990 = vadd.xlane.f32.xlu1 %v1989_v34  ;;  %2529 = vmatpush3.msra.mxu0 %v2018_v39 }
 0x5fc   : > { %v1994_v36 = vsel %vm652_vm0, %v1993_v35, 0.0 }
 0x5fd   : > { %1995 = vadd.xlane.f32.xlu0 %v1994_v36 }
 0x684   : > { %v1991_v44 = vpop.xlane.xlu1 %1990 }
 0x685   : > { %v1992_v45 = vmul.f32 0.03125, %v1991_v44 }
 0x686   : > { %v1996_v46 = vpop.xlane.xlu0 %1995 }
 0x687   : > { %v1998_v47 = vmul.f32 %v1992_v45, %v1992_v45  ;;  %v1997_v48 = vmul.f32 0.03125, %v1996_v46  ;;  %v2000_v51 = vsub.f32 %v3229_v33, %v1992_v45 }
 0x689   : > { %v1999_v49 = vsub.f32 %v1997_v48, %v1998_v47 }
 0x68b   : > { %v2001_v50 = vadd.f32 1e-05, %v1999_v49 }
 0x68d   : > { %2660 = vrsqrt.f32 %v2001_v50 }
 0x69a   : > { %v2661_v52 = vpop.eup %2660 }
 0x69b   : > { %v2003_v55 = vmul.f32 %v2661_v52, %v2000_v51 }
 0x69d   : > { %v2010_v57 = vmul.f32 %v2359_v54, %v2003_v55 }
 0x69f   : > { %v2017_v58 = vadd.f32 %v2360_v56, %v2010_v57 }
 0x6a1   : > { %2531 = vmatmul.mubr.msk.f32.vlgmr.msra.gmra.mxu0 %vm652_vm0, %v2017_v58 }
 0x761   : > { %v2098_v8 = vpop.f32.mrf.mxu0 }
 0x762   : > { %v2099_v10 = vadd.f32 %v2361_v7, %v2098_v8 }
 0x763   : > { %v2532_v11 = vpop.f32.mrf.mxu0 }
 0x764   : > { %v2103_v12 = vmul.f32 0.70710677, %v2099_v10  ;;  %v2102_v14 = vmul.f32 0.5, %v2099_v10 }
 0x766   : > { %2662 = verf.f32 %v2103_v12 }
 0x773   : > { %v2663_v13 = vpop.eup %2662 }
 0x774   : > { %v2105_v15 = vadd.f32 1.0, %v2663_v13 }
 0x776   : > { %v2106_v16 = vmul.f32 %v2105_v15, %v2102_v14 }
 0x778   : > { %2566 = vmatmul.mubr.f32.vlgmr.msra.gmra.mxu1 %v2106_v16 }
 0x838   : > { %v2196_v17 = vpop.f32.mrf.mxu1 }
 0x839   : > { %v2197_v18 = vadd.f32 %v2363_v9, %v2196_v17 }
 0x83a   : > { %v2567_v19 = vpop.f32.mrf.mxu1 }
 0x83b   : > { %v2200_v20 = vadd.f32 %v2197_v18, %v3229_v33 }
 0x83d   : > { %2201 = vst.msk [vmem:[%s644_s13] sm:$0xff] %vm652_vm0, %v2200_v20 }
 0x83e   : > { %2733 = shalt.err (!%p2730_p6)
}
 0x83f   : > { %s2734_s30 = scalar_lea.hbm %s2215_s2, 128  ;;  %s2738_s20 = scalar_lea.hbm %s3427_s22, 256 }
 0x840   : > { %p2735_p7 = scmp.ne.s32.totalorder %s2215_s2, %s2734_s30  ;;  %p2739_p4 = scmp.lt.s32.totalorder %s2215_s2, %s3427_s22 }
 0x841   : > { %p2740_p10 = scmp.lt.s32.totalorder %s2738_s20, %s2734_s30 }
 0x842   : > { %p2736_p1 = pnand %p2735_p7, %p2960_p9 }
 0x843   : > { %p2741_p8 = por %p2740_p10, %p2739_p4 }
 0x844   : > { %p2737_p2 = pneg %p2736_p1 }
 0x846   : > { %p2742_p0 = pnand %p2741_p8, %p2737_p2 }
 0x848   : > { %2745 = shalt.err (!%p2742_p0)
}
 0x849   : > { %2572 = dma.vmem_to_hbm [thread:$0]  (%p2960_p9), %s2218_s27, 128, %s2215_s2, %s2203_s15  }
 0x84a PF: > { %s3428_s29 = sld [smem:[#allocation14_spill]]  ;;  %p3430_p3 = scmp.ge.s32.totalorder %s2804_s19, 2 }
 0x84c   : > { %p2582_p13 = pnand %p3430_p3, %p2967_p11 }
 0x84e   : > { %p2583_p5 = pneg %p2582_p13 }
 0x850   : > { %s2229_s17 = sand.u32 1, %s3428_s29  }
 0x851   : > { %s2230_s25 = scalar_lea.sflag [#allocation7], %s2229_s17 }
 0x852   : > { %2779 = dma.done.wait (%p2583_p5), %s2230_s25, 128  }
 0x853   : > { %2781 = vsyncadd (%p2583_p5), %s2230_s25, 4294967168  ;;  %s37_s19 = sadd.s32 1, %s2804_s19   ;;  %s3431_s1 = sld [smem:[#allocation15_spill]] }
 0x854   : > { %p34_p12 = scmp.ge.s32.totalorder %s37_s19, 4   ;;  %s3432_s29 = sld [smem:[#allocation20_spill]] }
 0x855   : > { %s3433_s30 = sld [smem:[#allocation17_spill]]  ;;  %s3435_s27 = smov %s2788_s28 }
 0x856   : > { %s3434_s0 = sld [smem:[#allocation18_spill]]  ;;  %36 = sbr.rel (!%p34_p12) target bundleno = 16 (0x10), region = 163 }
 0x859   : > { %s3436_s28 = smov %s3431_s1 }
 0x85b   :  { %2235 = vsyncpa [#allocation6], 1 }
 0x85c   :  { %2237 = vsyncpa [#allocation6 + $0x1], 1 }
 0x85d   :  { %2238 = vsyncpa [#allocation9], 1 }
 0x85e   :  { %2240 = vsyncpa [#allocation9 + $0x1], 1 }
 0x85f   :  { %2241 = vsyncpa [#allocation7], 1 }
 0x860   :  { %2243 = vsyncpa [#allocation7 + $0x1], 1 }

</bundles_post_ra>
